<compile_context>
chip_gen: v7x
topology: tpu7x:2x2x1
jax: 0.10.0
libtpu: 0.0.40
codegen_flags: <defaults>
</compile_context>

<pallas_src>
import jax
import jax.numpy as jnp
from jax.experimental import pallas as pl
from jax.experimental.pallas import tpu as pltpu

C = 64      # backbone output channels (2048 for real resnet50; small synthetic here)
R = 256     # reduced_size
H = 64      # hidden_size
EPS = 1e-5  # nn.LayerNorm default eps


def _layernorm(x, g, b):
    mu = jnp.mean(x, axis=-1, keepdims=True)
    var = jnp.mean(jnp.square(x - mu), axis=-1, keepdims=True)
    return (x - mu) * jax.lax.rsqrt(var + EPS) * g + b


def _gru_cell_h0(x, w_ref, b_ref):
    # PyTorch GRU cell (gate order [r | z | n]) specialized to h_prev == 0, with
    # the gates pre-split in the wrapper:
    #   w_ref : (3, in, H)  stacked [W_ir, W_iz, W_in]       (x @ W convention)
    #   b_ref : (4, H)      [b_ir + b_hr, b_iz + b_hz, b_in, b_hn]
    # h0 == 0 drops the h @ W_hh matmul and the z * h term (exact).
    b = b_ref[...]
    r = jax.nn.sigmoid(jnp.dot(x, w_ref[0], preferred_element_type=jnp.float32) + b[0])
    z = jax.nn.sigmoid(jnp.dot(x, w_ref[1], preferred_element_type=jnp.float32) + b[1])
    n = jnp.tanh(jnp.dot(x, w_ref[2], preferred_element_type=jnp.float32) + b[2] + r * b[3])
    return (1.0 - z) * n


def qa_kernel(f_ref, w_dr_ref, b_dr_ref, g1_ref, be1_ref,
              w1_ref, b1_ref, w2_ref, b2_ref,
              g2_ref, be2_ref, w_reg_ref, b_reg_ref, q_ref):
    # f tile: (tile_n, HW/k, k*C), channels-last, native dtype from HBM.
    # AdaptiveAvgPool2d(1): sublane-axis sum accumulated directly in f32 -- no
    # materialized f32 copy of the tile.  The 1/HW scale is folded into w_dr.
    pooled = jnp.sum(f_ref[...], axis=1, dtype=jnp.float32)          # (tile_n, k*C)
    # self.dr = Linear(C, R) + LayerNorm(R)
    y = jnp.dot(pooled, w_dr_ref[...],
                preferred_element_type=jnp.float32) + b_dr_ref[...]
    y = _layernorm(y, g1_ref[...], be1_ref[...])                     # (tile_n, R)
    # self.fp = GRU(R, H, num_layers=2), seq_len == 1, h0 == 0 for both layers
    h1 = _gru_cell_h0(y, w1_ref, b1_ref)
    h2 = _gru_cell_h0(h1, w2_ref, b2_ref)
    # self.regression = LayerNorm(H) + Linear(H, 1)
    zf = _layernorm(h2, g2_ref[...], be2_ref[...])
    # (tile_n,H)@(H,1) would waste an MXU push and emit 1-lane masked stores;
    # do the dot on the VPU and store a lane-dense (1, tile_n) row.
    q = jnp.sum(zf * w_reg_ref[...], axis=-1)                        # (tile_n,)
    q_ref[...] = q.reshape(1, -1) + b_reg_ref[...]                   # (1, tile_n)


def qa_forward(f_nhwc, p, *, tile_n=None):
    """f_nhwc: backbone feature map, channels-last (N, H, W, C), any float dtype.

    No transpose and no dtype cast happen in the wrapper (the kernel is
    HBM-bound on f; an extra pass over it would dominate the whole op).
    """
    N, hs, ws, c = f_nhwc.shape
    hw = hs * ws

    # Derive sizes from the params (avoids silent mismatch vs. module constants).
    c_in, red = p['w_dr'].shape
    hid = p['wih1'].shape[1] // 3
    assert c_in == c, (c_in, c)
    assert p['wih1'].shape == (red, 3 * hid), p['wih1'].shape
    assert p['wih2'].shape == (hid, 3 * hid), p['wih2'].shape
    assert p['w_reg'].shape == (hid, 1), p['w_reg'].shape

    # ---- lane repack: fold k spatial rows into the 128-wide lane axis --------
    k = 1
    if c < 128 and 128 % c == 0 and hw % (128 // c) == 0:
        k = 128 // c
    hw_k, c_k = hw // k, c * k
    f = f_nhwc.reshape(N, hw_k, c_k)          # free, contiguous reshape

    # Fold the mean-pool scale into w_dr (exact: (x/hw)@W == x@(W/hw)) and stack
    # k copies row-wise so pooled_(k*C) @ w_dr_stacked equals the full-C result.
    w_dr_s = jnp.concatenate([p['w_dr'] * (1.0 / hw)] * k, axis=0).astype(jnp.float32)

    # Pre-split GRU weights/biases per gate (h0 == 0 specialization).
    def _split_gru(wih, bih, bhh):
        w = jnp.stack([wih[:, 0 * hid:1 * hid],
                       wih[:, 1 * hid:2 * hid],
                       wih[:, 2 * hid:3 * hid]]).astype(jnp.float32)   # (3, in, H)
        bi = bih.reshape(3, hid)
        bh = bhh.reshape(3, hid)
        b = jnp.stack([bi[0] + bh[0], bi[1] + bh[1], bi[2], bh[2]]).astype(jnp.float32)
        return w, b                                                    # (3,in,H), (4,H)

    w1, b1 = _split_gru(p['wih1'], p['bih1'], p['bhh1'])
    w2, b2 = _split_gru(p['wih2'], p['bih2'], p['bhh2'])
    w_reg_row = p['w_reg'].reshape(1, hid).astype(jnp.float32)

    weights = (w_dr_s, p['b_dr'], p['ln1_g'], p['ln1_b'],
               w1, b1, w2, b2,
               p['ln2_g'], p['ln2_b'], w_reg_row, p['b_reg'])

    # ---- generation-aware tile sizing / VMEM limit ---------------------------
    try:
        vmem_cap = int(pltpu.get_tpu_info().vmem_capacity_bytes)
    except Exception:
        vmem_cap = 64 * 1024 * 1024            # conservative (v7x per-TC)
    f_budget = max(8 << 20, int(vmem_cap * 0.45))   # ~57 MiB on 128 MiB parts, ~28 MiB on v7x

    per_row_bytes = hw_k * c_k * f.dtype.itemsize
    max_rows = max(8, (f_budget // (2 * per_row_bytes)) // 8 * 8)
    n_pad8 = pl.cdiv(N, 8) * 8
    if tile_n is None:
        tile_n = max_rows
    tile_n = max(8, min(tile_n, max_rows, n_pad8))
    # Keep >= 2 grid steps when the batch allows it: a 1-step grid has no
    # pipelining overlap and leaves the second TensorCore idle on v7x.
    # (For tiny N with huge HW one could instead add an "arbitrary" HW grid
    # axis with a pooled accumulator; not needed at these sizes.)
    if tile_n >= n_pad8 and n_pad8 >= 16:
        tile_n = pl.cdiv(n_pad8 // 2, 8) * 8

    n_pad = pl.cdiv(N, tile_n) * tile_n
    if n_pad != N:
        f = jnp.pad(f, ((0, n_pad - N), (0, 0), (0, 0)))
    n_tiles = n_pad // tile_n

    f_tile_bytes = 2 * tile_n * per_row_bytes                       # double-buffered f
    weight_bytes = 2 * sum(int(a.size) * a.dtype.itemsize for a in weights)
    vmem_limit = min(int(vmem_cap * 0.9),
                     max(32 << 20, f_tile_bytes + weight_bytes + (4 << 20)))

    # ---- specs ----------------------------------------------------------------
    def _const_spec(arr, single_buffer):
        zeros = (0,) * arr.ndim
        if single_buffer:
            # Block index never changes across the grid -> 1 buffer is enough.
            return pl.BlockSpec(arr.shape, lambda i, z=zeros: z,
                                pipeline_mode=pl.Buffered(1))
        return pl.BlockSpec(arr.shape, lambda i, z=zeros: z)

    out_shape = jax.ShapeDtypeStruct((n_tiles, tile_n), jnp.float32)
    out_spec = pl.BlockSpec((1, tile_n), lambda i: (i, 0))          # lane-dense stores

    def _run(single_buffer_weights):
        in_specs = ([pl.BlockSpec((tile_n, hw_k, c_k), lambda i: (i, 0, 0))]
                    + [_const_spec(a, single_buffer_weights) for a in weights])
        return pl.pallas_call(
            qa_kernel,
            out_shape=out_shape,
            grid=(n_tiles,),
            in_specs=in_specs,
            out_specs=out_spec,
            compiler_params=pltpu.CompilerParams(
                dimension_semantics=("parallel",),   # megacore on v7x; no-op elsewhere
                vmem_limit_bytes=int(vmem_limit)),
        )(f, *weights)

    try:
        q = _run(True)       # single-buffered weights
    except Exception:        # pipeline_mode not supported on this JAX version
        q = _run(False)
    return q.reshape(n_pad, 1)[:N]


# ----------------------------- pure-JAX reference -----------------------------

def _gru_cell_full(x, h, w_ih, w_hh, b_ih, b_hh, hid):
    # Full PyTorch GRU cell (proves the kernel's h0 == 0 specialization exact).
    gx = jnp.dot(x, w_ih) + b_ih
    gh = jnp.dot(h, w_hh) + b_hh
    r = jax.nn.sigmoid(gx[:, :hid] + gh[:, :hid])
    z = jax.nn.sigmoid(gx[:, hid:2 * hid] + gh[:, hid:2 * hid])
    n = jnp.tanh(gx[:, 2 * hid:] + r * gh[:, 2 * hid:])
    return (1.0 - z) * n + z * h


def qa_reference(f_nhwc, p):
    N = f_nhwc.shape[0]
    hid = p['wih1'].shape[1] // 3
    pooled = jnp.mean(f_nhwc.astype(jnp.float32), axis=(1, 2))       # (N, C)
    y = pooled @ p['w_dr'] + p['b_dr']
    y = _layernorm(y, p['ln1_g'], p['ln1_b'])
    h0 = jnp.zeros((N, hid), jnp.float32)
    h1 = _gru_cell_full(y, h0, p['wih1'], p['whh1'], p['bih1'], p['bhh1'], hid)
    h2 = _gru_cell_full(h1, h0, p['wih2'], p['whh2'], p['bih2'], p['bhh2'], hid)
    z = _layernorm(h2, p['ln2_g'], p['ln2_b'])
    return z @ p['w_reg'] + p['b_reg']


def init_params(key):
    keys = jax.random.split(key, 12)

    def u(k, shape, scale):
        return jax.random.uniform(k, shape, jnp.float32, -scale, scale)

    sc_dr = float(C) ** -0.5
    sc_g = float(H) ** -0.5
    return {
        'w_dr': u(keys[0], (C, R), sc_dr),
        'b_dr': u(keys[1], (1, R), sc_dr),
        'ln1_g': jnp.ones((1, R), jnp.float32),
        'ln1_b': jnp.zeros((1, R), jnp.float32),
        'wih1': u(keys[2], (R, 3 * H), sc_g),
        'whh1': u(keys[3], (H, 3 * H), sc_g),   # unused by kernel (h0 == 0), kept for the reference
        'bih1': u(keys[4], (1, 3 * H), sc_g),
        'bhh1': u(keys[5], (1, 3 * H), sc_g),
        'wih2': u(keys[6], (H, 3 * H), sc_g),
        'whh2': u(keys[7], (H, 3 * H), sc_g),   # unused by kernel (h0 == 0), kept for the reference
        'bih2': u(keys[8], (1, 3 * H), sc_g),
        'bhh2': u(keys[9], (1, 3 * H), sc_g),
        'ln2_g': jnp.ones((1, H), jnp.float32),
        'ln2_b': jnp.zeros((1, H), jnp.float32),
        'w_reg': u(keys[10], (H, 1), sc_g),
        'b_reg': u(keys[11], (1, 1), sc_g),
    }


if __name__ == "__main__":
    key = jax.random.PRNGKey(0)
    k_f, k_p = jax.random.split(key)

    N, Hs, Ws = 2, 8, 8
    # Backbone feature map in channels-last (native TPU conv) layout; kept f32
    # so the kernel reads it directly -- no wrapper-side transpose/cast pass.
    f = jax.random.normal(k_f, (N, Hs, Ws, C), jnp.float32)
    params = init_params(k_p)

    q = qa_forward(f, params)
    q = jax.block_until_ready(q)

    q_ref = qa_reference(f, params)
    assert q.shape == (N, 1), q.shape
    assert jnp.allclose(q, q_ref, rtol=1e-3, atol=1e-3), (q, q_ref)

    print("KERNEL_OK")
</pallas_src>

<mosaic_0001>
module attributes {stable_mosaic.version = 11 : i64} {
  func.func @qa_kernel(%arg0: i32, %arg1: memref<8x32x128xf32, #tpu.memory_space<vmem>>, %arg2: memref<128x256xf32, #tpu.memory_space<vmem>>, %arg3: memref<1x256xf32, #tpu.memory_space<vmem>>, %arg4: memref<1x256xf32, #tpu.memory_space<vmem>>, %arg5: memref<1x256xf32, #tpu.memory_space<vmem>>, %arg6: memref<3x256x64xf32, #tpu.memory_space<vmem>>, %arg7: memref<4x64xf32, #tpu.memory_space<vmem>>, %arg8: memref<3x64x64xf32, #tpu.memory_space<vmem>>, %arg9: memref<4x64xf32, #tpu.memory_space<vmem>>, %arg10: memref<1x64xf32, #tpu.memory_space<vmem>>, %arg11: memref<1x64xf32, #tpu.memory_space<vmem>>, %arg12: memref<1x64xf32, #tpu.memory_space<vmem>>, %arg13: memref<1x1xf32, #tpu.memory_space<vmem>>, %arg14: memref<1x8xf32, #tpu.memory_space<vmem>>) attributes {dimension_semantics = [#tpu.dimension_semantics<parallel>], iteration_bounds = array<i64: 1>, scalar_prefetch = 0 : i64, scratch_operands = 0 : i64, tpu.core_type = #tpu.core_type<tc>, window_params = [{transform_indices = @transform_0, window_bounds = array<i64: 8, 32, 128>}, {pipeline_mode = #tpu.pipeline_mode<synchronous>, transform_indices = @transform_1, window_bounds = array<i64: 128, 256>}, {pipeline_mode = #tpu.pipeline_mode<synchronous>, transform_indices = @transform_2, window_bounds = array<i64: 1, 256>}, {pipeline_mode = #tpu.pipeline_mode<synchronous>, transform_indices = @transform_3, window_bounds = array<i64: 1, 256>}, {pipeline_mode = #tpu.pipeline_mode<synchronous>, transform_indices = @transform_4, window_bounds = array<i64: 1, 256>}, {pipeline_mode = #tpu.pipeline_mode<synchronous>, transform_indices = @transform_5, window_bounds = array<i64: 3, 256, 64>}, {pipeline_mode = #tpu.pipeline_mode<synchronous>, transform_indices = @transform_6, window_bounds = array<i64: 4, 64>}, {pipeline_mode = #tpu.pipeline_mode<synchronous>, transform_indices = @transform_7, window_bounds = array<i64: 3, 64, 64>}, {pipeline_mode = #tpu.pipeline_mode<synchronous>, transform_indices = @transform_8, window_bounds = array<i64: 4, 64>}, {pipeline_mode = #tpu.pipeline_mode<synchronous>, transform_indices = @transform_9, window_bounds = array<i64: 1, 64>}, {pipeline_mode = #tpu.pipeline_mode<synchronous>, transform_indices = @transform_10, window_bounds = array<i64: 1, 64>}, {pipeline_mode = #tpu.pipeline_mode<synchronous>, transform_indices = @transform_11, window_bounds = array<i64: 1, 64>}, {pipeline_mode = #tpu.pipeline_mode<synchronous>, transform_indices = @transform_12, window_bounds = array<i64: 1, 1>}, {transform_indices = @transform_13, window_bounds = array<i64: 1, 8>}]} {
    %c0 = arith.constant 0 : index
    %c0_0 = arith.constant 0 : index
    %c0_1 = arith.constant 0 : index
    %0 = vector.load %arg1[%c0, %c0_0, %c0_1] : memref<8x32x128xf32, #tpu.memory_space<vmem>>, vector<8x32x128xf32>
    %cst = arith.constant dense<0.000000e+00> : vector<8x128xf32>
    %1 = vector.multi_reduction <add>, %0, %cst [1] : vector<8x32x128xf32> to vector<8x128xf32>
    %c0_2 = arith.constant 0 : index
    %c0_3 = arith.constant 0 : index
    %2 = vector.load %arg2[%c0_2, %c0_3] : memref<128x256xf32, #tpu.memory_space<vmem>>, vector<128x256xf32>
    %cst_4 = arith.constant dense<0.000000e+00> : vector<8x256xf32>
    %3 = tpu.matmul %1, %2, %cst_4 {dimension_numbers = #tpu.dot_dimension_numbers<[1], [0], [0], [1], [0, 0, 1, 1], [], []>} : vector<8x128xf32>, vector<128x256xf32>, vector<8x256xf32> -> vector<8x256xf32>
    %c0_5 = arith.constant 0 : index
    %c0_6 = arith.constant 0 : index
    %4 = vector.load %arg3[%c0_5, %c0_6] : memref<1x256xf32, #tpu.memory_space<vmem>>, vector<1x256xf32>
    %5 = vector.broadcast %4 : vector<1x256xf32> to vector<8x256xf32>
    %6 = arith.addf %3, %5 : vector<8x256xf32>
    %c0_7 = arith.constant 0 : index
    %c0_8 = arith.constant 0 : index
    %7 = vector.load %arg4[%c0_7, %c0_8] : memref<1x256xf32, #tpu.memory_space<vmem>>, vector<1x256xf32>
    %c0_9 = arith.constant 0 : index
    %c0_10 = arith.constant 0 : index
    %8 = vector.load %arg5[%c0_9, %c0_10] : memref<1x256xf32, #tpu.memory_space<vmem>>, vector<1x256xf32>
    %cst_11 = arith.constant dense<0.000000e+00> : vector<8xf32>
    %9 = vector.multi_reduction <add>, %6, %cst_11 [1] : vector<8x256xf32> to vector<8xf32>
    %10 = vector.shape_cast %9 : vector<8xf32> to vector<8x1xf32>
    %cst_12 = arith.constant 2.560000e+02 : f32
    %11 = vector.broadcast %cst_12 : f32 to vector<8x1xf32>
    %12 = arith.divf %10, %11 : vector<8x1xf32>
    %13 = vector.broadcast %12 : vector<8x1xf32> to vector<8x256xf32>
    %14 = arith.subf %6, %13 : vector<8x256xf32>
    %15 = arith.mulf %14, %14 : vector<8x256xf32>
    %cst_13 = arith.constant dense<0.000000e+00> : vector<8xf32>
    %16 = vector.multi_reduction <add>, %15, %cst_13 [1] : vector<8x256xf32> to vector<8xf32>
    %17 = vector.shape_cast %16 : vector<8xf32> to vector<8x1xf32>
    %cst_14 = arith.constant 2.560000e+02 : f32
    %18 = vector.broadcast %cst_14 : f32 to vector<8x1xf32>
    %19 = arith.divf %17, %18 : vector<8x1xf32>
    %20 = vector.broadcast %12 : vector<8x1xf32> to vector<8x256xf32>
    %21 = arith.subf %6, %20 : vector<8x256xf32>
    %cst_15 = arith.constant 9.99999974E-6 : f32
    %22 = vector.broadcast %cst_15 : f32 to vector<8x1xf32>
    %23 = arith.addf %19, %22 : vector<8x1xf32>
    %24 = math.rsqrt %23 : vector<8x1xf32>
    %25 = vector.broadcast %24 : vector<8x1xf32> to vector<8x256xf32>
    %26 = arith.mulf %21, %25 : vector<8x256xf32>
    %27 = vector.broadcast %7 : vector<1x256xf32> to vector<8x256xf32>
    %28 = arith.mulf %26, %27 : vector<8x256xf32>
    %29 = vector.broadcast %8 : vector<1x256xf32> to vector<8x256xf32>
    %30 = arith.addf %28, %29 : vector<8x256xf32>
    %c0_16 = arith.constant 0 : index
    %c0_17 = arith.constant 0 : index
    %31 = vector.load %arg7[%c0_16, %c0_17] : memref<4x64xf32, #tpu.memory_space<vmem>>, vector<4x64xf32>
    %c0_18 = arith.constant 0 : index
    %c0_19 = arith.constant 0 : index
    %c0_20 = arith.constant 0 : index
    %32 = vector.load %arg6[%c0_18, %c0_19, %c0_20] : memref<3x256x64xf32, #tpu.memory_space<vmem>>, vector<1x256x64xf32>
    %33 = vector.shape_cast %32 : vector<1x256x64xf32> to vector<256x64xf32>
    %cst_21 = arith.constant dense<0.000000e+00> : vector<8x64xf32>
    %34 = tpu.matmul %30, %33, %cst_21 {dimension_numbers = #tpu.dot_dimension_numbers<[1], [0], [0], [1], [0, 0, 1, 1], [], []>} : vector<8x256xf32>, vector<256x64xf32>, vector<8x64xf32> -> vector<8x64xf32>
    %35 = vector.extract_strided_slice %31 {offsets = [0, 0], sizes = [1, 64], strides = [1, 1]} : vector<4x64xf32> to vector<1x64xf32>
    %36 = vector.shape_cast %35 : vector<1x64xf32> to vector<64xf32>
    %37 = vector.shape_cast %36 : vector<64xf32> to vector<1x64xf32>
    %38 = vector.broadcast %37 : vector<1x64xf32> to vector<8x64xf32>
    %39 = arith.addf %34, %38 : vector<8x64xf32>
    %40 = arith.negf %39 : vector<8x64xf32>
    %41 = math.exp %40 : vector<8x64xf32>
    %cst_22 = arith.constant 1.000000e+00 : f32
    %42 = vector.broadcast %cst_22 : f32 to vector<8x64xf32>
    %43 = arith.addf %42, %41 : vector<8x64xf32>
    %44 = arith.divf %42, %43 : vector<8x64xf32>
    %c1 = arith.constant 1 : index
    %c0_23 = arith.constant 0 : index
    %c0_24 = arith.constant 0 : index
    %45 = vector.load %arg6[%c1, %c0_23, %c0_24] : memref<3x256x64xf32, #tpu.memory_space<vmem>>, vector<1x256x64xf32>
    %46 = vector.shape_cast %45 : vector<1x256x64xf32> to vector<256x64xf32>
    %cst_25 = arith.constant dense<0.000000e+00> : vector<8x64xf32>
    %47 = tpu.matmul %30, %46, %cst_25 {dimension_numbers = #tpu.dot_dimension_numbers<[1], [0], [0], [1], [0, 0, 1, 1], [], []>} : vector<8x256xf32>, vector<256x64xf32>, vector<8x64xf32> -> vector<8x64xf32>
    %48 = vector.extract_strided_slice %31 {offsets = [1, 0], sizes = [1, 64], strides = [1, 1]} : vector<4x64xf32> to vector<1x64xf32>
    %49 = vector.shape_cast %48 : vector<1x64xf32> to vector<64xf32>
    %50 = vector.shape_cast %49 : vector<64xf32> to vector<1x64xf32>
    %51 = vector.broadcast %50 : vector<1x64xf32> to vector<8x64xf32>
    %52 = arith.addf %47, %51 : vector<8x64xf32>
    %53 = arith.negf %52 : vector<8x64xf32>
    %54 = math.exp %53 : vector<8x64xf32>
    %cst_26 = arith.constant 1.000000e+00 : f32
    %55 = vector.broadcast %cst_26 : f32 to vector<8x64xf32>
    %56 = arith.addf %55, %54 : vector<8x64xf32>
    %57 = arith.divf %55, %56 : vector<8x64xf32>
    %c2 = arith.constant 2 : index
    %c0_27 = arith.constant 0 : index
    %c0_28 = arith.constant 0 : index
    %58 = vector.load %arg6[%c2, %c0_27, %c0_28] : memref<3x256x64xf32, #tpu.memory_space<vmem>>, vector<1x256x64xf32>
    %59 = vector.shape_cast %58 : vector<1x256x64xf32> to vector<256x64xf32>
    %cst_29 = arith.constant dense<0.000000e+00> : vector<8x64xf32>
    %60 = tpu.matmul %30, %59, %cst_29 {dimension_numbers = #tpu.dot_dimension_numbers<[1], [0], [0], [1], [0, 0, 1, 1], [], []>} : vector<8x256xf32>, vector<256x64xf32>, vector<8x64xf32> -> vector<8x64xf32>
    %61 = vector.extract_strided_slice %31 {offsets = [2, 0], sizes = [1, 64], strides = [1, 1]} : vector<4x64xf32> to vector<1x64xf32>
    %62 = vector.shape_cast %61 : vector<1x64xf32> to vector<64xf32>
    %63 = vector.shape_cast %62 : vector<64xf32> to vector<1x64xf32>
    %64 = vector.broadcast %63 : vector<1x64xf32> to vector<8x64xf32>
    %65 = arith.addf %60, %64 : vector<8x64xf32>
    %66 = vector.extract_strided_slice %31 {offsets = [3, 0], sizes = [1, 64], strides = [1, 1]} : vector<4x64xf32> to vector<1x64xf32>
    %67 = vector.shape_cast %66 : vector<1x64xf32> to vector<64xf32>
    %68 = vector.shape_cast %67 : vector<64xf32> to vector<1x64xf32>
    %69 = vector.broadcast %68 : vector<1x64xf32> to vector<8x64xf32>
    %70 = arith.mulf %44, %69 : vector<8x64xf32>
    %71 = arith.addf %65, %70 : vector<8x64xf32>
    %72 = math.tanh %71 : vector<8x64xf32>
    %cst_30 = arith.constant 1.000000e+00 : f32
    %73 = vector.broadcast %cst_30 : f32 to vector<8x64xf32>
    %74 = arith.subf %73, %57 : vector<8x64xf32>
    %75 = arith.mulf %74, %72 : vector<8x64xf32>
    %c0_31 = arith.constant 0 : index
    %c0_32 = arith.constant 0 : index
    %76 = vector.load %arg9[%c0_31, %c0_32] : memref<4x64xf32, #tpu.memory_space<vmem>>, vector<4x64xf32>
    %c0_33 = arith.constant 0 : index
    %c0_34 = arith.constant 0 : index
    %c0_35 = arith.constant 0 : index
    %77 = vector.load %arg8[%c0_33, %c0_34, %c0_35] : memref<3x64x64xf32, #tpu.memory_space<vmem>>, vector<1x64x64xf32>
    %78 = vector.shape_cast %77 : vector<1x64x64xf32> to vector<64x64xf32>
    %cst_36 = arith.constant dense<0.000000e+00> : vector<8x64xf32>
    %79 = tpu.matmul %75, %78, %cst_36 {dimension_numbers = #tpu.dot_dimension_numbers<[1], [0], [0], [1], [0, 0, 1, 1], [], []>} : vector<8x64xf32>, vector<64x64xf32>, vector<8x64xf32> -> vector<8x64xf32>
    %80 = vector.extract_strided_slice %76 {offsets = [0, 0], sizes = [1, 64], strides = [1, 1]} : vector<4x64xf32> to vector<1x64xf32>
    %81 = vector.shape_cast %80 : vector<1x64xf32> to vector<64xf32>
    %82 = vector.shape_cast %81 : vector<64xf32> to vector<1x64xf32>
    %83 = vector.broadcast %82 : vector<1x64xf32> to vector<8x64xf32>
    %84 = arith.addf %79, %83 : vector<8x64xf32>
    %85 = arith.negf %84 : vector<8x64xf32>
    %86 = math.exp %85 : vector<8x64xf32>
    %cst_37 = arith.constant 1.000000e+00 : f32
    %87 = vector.broadcast %cst_37 : f32 to vector<8x64xf32>
    %88 = arith.addf %87, %86 : vector<8x64xf32>
    %89 = arith.divf %87, %88 : vector<8x64xf32>
    %c1_38 = arith.constant 1 : index
    %c0_39 = arith.constant 0 : index
    %c0_40 = arith.constant 0 : index
    %90 = vector.load %arg8[%c1_38, %c0_39, %c0_40] : memref<3x64x64xf32, #tpu.memory_space<vmem>>, vector<1x64x64xf32>
    %91 = vector.shape_cast %90 : vector<1x64x64xf32> to vector<64x64xf32>
    %cst_41 = arith.constant dense<0.000000e+00> : vector<8x64xf32>
    %92 = tpu.matmul %75, %91, %cst_41 {dimension_numbers = #tpu.dot_dimension_numbers<[1], [0], [0], [1], [0, 0, 1, 1], [], []>} : vector<8x64xf32>, vector<64x64xf32>, vector<8x64xf32> -> vector<8x64xf32>
    %93 = vector.extract_strided_slice %76 {offsets = [1, 0], sizes = [1, 64], strides = [1, 1]} : vector<4x64xf32> to vector<1x64xf32>
    %94 = vector.shape_cast %93 : vector<1x64xf32> to vector<64xf32>
    %95 = vector.shape_cast %94 : vector<64xf32> to vector<1x64xf32>
    %96 = vector.broadcast %95 : vector<1x64xf32> to vector<8x64xf32>
    %97 = arith.addf %92, %96 : vector<8x64xf32>
    %98 = arith.negf %97 : vector<8x64xf32>
    %99 = math.exp %98 : vector<8x64xf32>
    %cst_42 = arith.constant 1.000000e+00 : f32
    %100 = vector.broadcast %cst_42 : f32 to vector<8x64xf32>
    %101 = arith.addf %100, %99 : vector<8x64xf32>
    %102 = arith.divf %100, %101 : vector<8x64xf32>
    %c2_43 = arith.constant 2 : index
    %c0_44 = arith.constant 0 : index
    %c0_45 = arith.constant 0 : index
    %103 = vector.load %arg8[%c2_43, %c0_44, %c0_45] : memref<3x64x64xf32, #tpu.memory_space<vmem>>, vector<1x64x64xf32>
    %104 = vector.shape_cast %103 : vector<1x64x64xf32> to vector<64x64xf32>
    %cst_46 = arith.constant dense<0.000000e+00> : vector<8x64xf32>
    %105 = tpu.matmul %75, %104, %cst_46 {dimension_numbers = #tpu.dot_dimension_numbers<[1], [0], [0], [1], [0, 0, 1, 1], [], []>} : vector<8x64xf32>, vector<64x64xf32>, vector<8x64xf32> -> vector<8x64xf32>
    %106 = vector.extract_strided_slice %76 {offsets = [2, 0], sizes = [1, 64], strides = [1, 1]} : vector<4x64xf32> to vector<1x64xf32>
    %107 = vector.shape_cast %106 : vector<1x64xf32> to vector<64xf32>
    %108 = vector.shape_cast %107 : vector<64xf32> to vector<1x64xf32>
    %109 = vector.broadcast %108 : vector<1x64xf32> to vector<8x64xf32>
    %110 = arith.addf %105, %109 : vector<8x64xf32>
    %111 = vector.extract_strided_slice %76 {offsets = [3, 0], sizes = [1, 64], strides = [1, 1]} : vector<4x64xf32> to vector<1x64xf32>
    %112 = vector.shape_cast %111 : vector<1x64xf32> to vector<64xf32>
    %113 = vector.shape_cast %112 : vector<64xf32> to vector<1x64xf32>
    %114 = vector.broadcast %113 : vector<1x64xf32> to vector<8x64xf32>
    %115 = arith.mulf %89, %114 : vector<8x64xf32>
    %116 = arith.addf %110, %115 : vector<8x64xf32>
    %117 = math.tanh %116 : vector<8x64xf32>
    %cst_47 = arith.constant 1.000000e+00 : f32
    %118 = vector.broadcast %cst_47 : f32 to vector<8x64xf32>
    %119 = arith.subf %118, %102 : vector<8x64xf32>
    %120 = arith.mulf %119, %117 : vector<8x64xf32>
    %c0_48 = arith.constant 0 : index
    %c0_49 = arith.constant 0 : index
    %121 = vector.load %arg10[%c0_48, %c0_49] : memref<1x64xf32, #tpu.memory_space<vmem>>, vector<1x64xf32>
    %c0_50 = arith.constant 0 : index
    %c0_51 = arith.constant 0 : index
    %122 = vector.load %arg11[%c0_50, %c0_51] : memref<1x64xf32, #tpu.memory_space<vmem>>, vector<1x64xf32>
    %cst_52 = arith.constant dense<0.000000e+00> : vector<8xf32>
    %123 = vector.multi_reduction <add>, %120, %cst_52 [1] : vector<8x64xf32> to vector<8xf32>
    %124 = vector.shape_cast %123 : vector<8xf32> to vector<8x1xf32>
    %cst_53 = arith.constant 6.400000e+01 : f32
    %125 = vector.broadcast %cst_53 : f32 to vector<8x1xf32>
    %126 = arith.divf %124, %125 : vector<8x1xf32>
    %127 = vector.broadcast %126 : vector<8x1xf32> to vector<8x64xf32>
    %128 = arith.subf %120, %127 : vector<8x64xf32>
    %129 = arith.mulf %128, %128 : vector<8x64xf32>
    %cst_54 = arith.constant dense<0.000000e+00> : vector<8xf32>
    %130 = vector.multi_reduction <add>, %129, %cst_54 [1] : vector<8x64xf32> to vector<8xf32>
    %131 = vector.shape_cast %130 : vector<8xf32> to vector<8x1xf32>
    %cst_55 = arith.constant 6.400000e+01 : f32
    %132 = vector.broadcast %cst_55 : f32 to vector<8x1xf32>
    %133 = arith.divf %131, %132 : vector<8x1xf32>
    %134 = vector.broadcast %126 : vector<8x1xf32> to vector<8x64xf32>
    %135 = arith.subf %120, %134 : vector<8x64xf32>
    %cst_56 = arith.constant 9.99999974E-6 : f32
    %136 = vector.broadcast %cst_56 : f32 to vector<8x1xf32>
    %137 = arith.addf %133, %136 : vector<8x1xf32>
    %138 = math.rsqrt %137 : vector<8x1xf32>
    %139 = vector.broadcast %138 : vector<8x1xf32> to vector<8x64xf32>
    %140 = arith.mulf %135, %139 : vector<8x64xf32>
    %141 = vector.broadcast %121 : vector<1x64xf32> to vector<8x64xf32>
    %142 = arith.mulf %140, %141 : vector<8x64xf32>
    %143 = vector.broadcast %122 : vector<1x64xf32> to vector<8x64xf32>
    %144 = arith.addf %142, %143 : vector<8x64xf32>
    %c0_57 = arith.constant 0 : index
    %c0_58 = arith.constant 0 : index
    %145 = vector.load %arg12[%c0_57, %c0_58] : memref<1x64xf32, #tpu.memory_space<vmem>>, vector<1x64xf32>
    %146 = vector.broadcast %145 : vector<1x64xf32> to vector<8x64xf32>
    %147 = arith.mulf %144, %146 : vector<8x64xf32>
    %cst_59 = arith.constant dense<0.000000e+00> : vector<8xf32>
    %148 = vector.multi_reduction <add>, %147, %cst_59 [1] : vector<8x64xf32> to vector<8xf32>
    %149 = vector.shape_cast %148 : vector<8xf32> to vector<1x8xf32>
    %c0_60 = arith.constant 0 : index
    %c0_61 = arith.constant 0 : index
    %150 = vector.load %arg13[%c0_60, %c0_61] : memref<1x1xf32, #tpu.memory_space<vmem>>, vector<1x1xf32>
    %151 = vector.broadcast %150 : vector<1x1xf32> to vector<1x8xf32>
    %152 = arith.addf %149, %151 : vector<1x8xf32>
    %c0_62 = arith.constant 0 : index
    %c0_63 = arith.constant 0 : index
    %153 = vector.load %arg14[%c0_62, %c0_63] : memref<1x8xf32, #tpu.memory_space<vmem>>, vector<1x8xf32>
    tpu.vector_store %arg14[%c0_62, %c0_63], %152 {strides = array<i32>} : memref<1x8xf32, #tpu.memory_space<vmem>>, vector<1x8xf32>,
    return
  }
  func.func @transform_0(%arg0: i32) -> (i32, i32, i32) {
    %c0_i32 = arith.constant 0 : i32
    %c0_i32_0 = arith.constant 0 : i32
    %c0_i32_1 = arith.constant 0 : i32
    return %arg0, %c0_i32, %c0_i32_0 : i32, i32, i32
  }
  func.func @transform_1(%arg0: i32) -> (i32, i32) {
    %c0_i32 = arith.constant 0 : i32
    %c0_i32_0 = arith.constant 0 : i32
    %c0_i32_1 = arith.constant 0 : i32
    return %c0_i32, %c0_i32_0 : i32, i32
  }
  func.func @transform_2(%arg0: i32) -> (i32, i32) {
    %c0_i32 = arith.constant 0 : i32
    %c0_i32_0 = arith.constant 0 : i32
    %c0_i32_1 = arith.constant 0 : i32
    return %c0_i32, %c0_i32_0 : i32, i32
  }
  func.func @transform_3(%arg0: i32) -> (i32, i32) {
    %c0_i32 = arith.constant 0 : i32
    %c0_i32_0 = arith.constant 0 : i32
    %c0_i32_1 = arith.constant 0 : i32
    return %c0_i32, %c0_i32_0 : i32, i32
  }
  func.func @transform_4(%arg0: i32) -> (i32, i32) {
    %c0_i32 = arith.constant 0 : i32
    %c0_i32_0 = arith.constant 0 : i32
    %c0_i32_1 = arith.constant 0 : i32
    return %c0_i32, %c0_i32_0 : i32, i32
  }
  func.func @transform_5(%arg0: i32) -> (i32, i32, i32) {
    %c0_i32 = arith.constant 0 : i32
    %c0_i32_0 = arith.constant 0 : i32
    %c0_i32_1 = arith.constant 0 : i32
    %c0_i32_2 = arith.constant 0 : i32
    return %c0_i32, %c0_i32_0, %c0_i32_1 : i32, i32, i32
  }
  func.func @transform_6(%arg0: i32) -> (i32, i32) {
    %c0_i32 = arith.constant 0 : i32
    %c0_i32_0 = arith.constant 0 : i32
    %c0_i32_1 = arith.constant 0 : i32
    return %c0_i32, %c0_i32_0 : i32, i32
  }
  func.func @transform_7(%arg0: i32) -> (i32, i32, i32) {
    %c0_i32 = arith.constant 0 : i32
    %c0_i32_0 = arith.constant 0 : i32
    %c0_i32_1 = arith.constant 0 : i32
    %c0_i32_2 = arith.constant 0 : i32
    return %c0_i32, %c0_i32_0, %c0_i32_1 : i32, i32, i32
  }
  func.func @transform_8(%arg0: i32) -> (i32, i32) {
    %c0_i32 = arith.constant 0 : i32
    %c0_i32_0 = arith.constant 0 : i32
    %c0_i32_1 = arith.constant 0 : i32
    return %c0_i32, %c0_i32_0 : i32, i32
  }
  func.func @transform_9(%arg0: i32) -> (i32, i32) {
    %c0_i32 = arith.constant 0 : i32
    %c0_i32_0 = arith.constant 0 : i32
    %c0_i32_1 = arith.constant 0 : i32
    return %c0_i32, %c0_i32_0 : i32, i32
  }
  func.func @transform_10(%arg0: i32) -> (i32, i32) {
    %c0_i32 = arith.constant 0 : i32
    %c0_i32_0 = arith.constant 0 : i32
    %c0_i32_1 = arith.constant 0 : i32
    return %c0_i32, %c0_i32_0 : i32, i32
  }
  func.func @transform_11(%arg0: i32) -> (i32, i32) {
    %c0_i32 = arith.constant 0 : i32
    %c0_i32_0 = arith.constant 0 : i32
    %c0_i32_1 = arith.constant 0 : i32
    return %c0_i32, %c0_i32_0 : i32, i32
  }
  func.func @transform_12(%arg0: i32) -> (i32, i32) {
    %c0_i32 = arith.constant 0 : i32
    %c0_i32_0 = arith.constant 0 : i32
    %c0_i32_1 = arith.constant 0 : i32
    return %c0_i32, %c0_i32_0 : i32, i32
  }
  func.func @transform_13(%arg0: i32) -> (i32, i32) {
    %c0_i32 = arith.constant 0 : i32
    %c0_i32_0 = arith.constant 0 : i32
    return %arg0, %c0_i32 : i32, i32
  }
}

module attributes {stable_mosaic.version = 11 : i64} {
  func.func @qa_kernel(%arg0: i32, %arg1: memref<8x32x128xf32, #tpu.memory_space<vmem>>, %arg2: memref<128x256xf32, #tpu.memory_space<vmem>>, %arg3: memref<1x256xf32, #tpu.memory_space<vmem>>, %arg4: memref<1x256xf32, #tpu.memory_space<vmem>>, %arg5: memref<1x256xf32, #tpu.memory_space<vmem>>, %arg6: memref<3x256x64xf32, #tpu.memory_space<vmem>>, %arg7: memref<4x64xf32, #tpu.memory_space<vmem>>, %arg8: memref<3x64x64xf32, #tpu.memory_space<vmem>>, %arg9: memref<4x64xf32, #tpu.memory_space<vmem>>, %arg10: memref<1x64xf32, #tpu.memory_space<vmem>>, %arg11: memref<1x64xf32, #tpu.memory_space<vmem>>, %arg12: memref<1x64xf32, #tpu.memory_space<vmem>>, %arg13: memref<1x1xf32, #tpu.memory_space<vmem>>, %arg14: memref<1x8xf32, #tpu.memory_space<vmem>>) attributes {dimension_semantics = [#tpu.dimension_semantics<parallel>], iteration_bounds = array<i64: 1>, scalar_prefetch = 0 : i64, scratch_operands = 0 : i64, tpu.core_type = #tpu.core_type<tc>, window_params = [{transform_indices = @transform_0, window_bounds = array<i64: 8, 32, 128>}, {pipeline_mode = #tpu.pipeline_mode<synchronous>, transform_indices = @transform_1, window_bounds = array<i64: 128, 256>}, {pipeline_mode = #tpu.pipeline_mode<synchronous>, transform_indices = @transform_2, window_bounds = array<i64: 1, 256>}, {pipeline_mode = #tpu.pipeline_mode<synchronous>, transform_indices = @transform_3, window_bounds = array<i64: 1, 256>}, {pipeline_mode = #tpu.pipeline_mode<synchronous>, transform_indices = @transform_4, window_bounds = array<i64: 1, 256>}, {pipeline_mode = #tpu.pipeline_mode<synchronous>, transform_indices = @transform_5, window_bounds = array<i64: 3, 256, 64>}, {pipeline_mode = #tpu.pipeline_mode<synchronous>, transform_indices = @transform_6, window_bounds = array<i64: 4, 64>}, {pipeline_mode = #tpu.pipeline_mode<synchronous>, transform_indices = @transform_7, window_bounds = array<i64: 3, 64, 64>}, {pipeline_mode = #tpu.pipeline_mode<synchronous>, transform_indices = @transform_8, window_bounds = array<i64: 4, 64>}, {pipeline_mode = #tpu.pipeline_mode<synchronous>, transform_indices = @transform_9, window_bounds = array<i64: 1, 64>}, {pipeline_mode = #tpu.pipeline_mode<synchronous>, transform_indices = @transform_10, window_bounds = array<i64: 1, 64>}, {pipeline_mode = #tpu.pipeline_mode<synchronous>, transform_indices = @transform_11, window_bounds = array<i64: 1, 64>}, {pipeline_mode = #tpu.pipeline_mode<synchronous>, transform_indices = @transform_12, window_bounds = array<i64: 1, 1>}, {transform_indices = @transform_13, window_bounds = array<i64: 1, 8>}]} {
    %c0 = arith.constant 0 : index
    %c0_0 = arith.constant 0 : index
    %c0_1 = arith.constant 0 : index
    %0 = vector.load %arg1[%c0, %c0_0, %c0_1] : memref<8x32x128xf32, #tpu.memory_space<vmem>>, vector<8x32x128xf32>
    %cst = arith.constant dense<0.000000e+00> : vector<8x128xf32>
    %1 = vector.multi_reduction <add>, %0, %cst [1] : vector<8x32x128xf32> to vector<8x128xf32>
    %c0_2 = arith.constant 0 : index
    %c0_3 = arith.constant 0 : index
    %2 = vector.load %arg2[%c0_2, %c0_3] : memref<128x256xf32, #tpu.memory_space<vmem>>, vector<128x256xf32>
    %cst_4 = arith.constant dense<0.000000e+00> : vector<8x256xf32>
    %3 = tpu.matmul %1, %2, %cst_4 {dimension_numbers = #tpu.dot_dimension_numbers<[1], [0], [0], [1], [0, 0, 1, 1], [], []>} : vector<8x128xf32>, vector<128x256xf32>, vector<8x256xf32> -> vector<8x256xf32>
    %c0_5 = arith.constant 0 : index
    %c0_6 = arith.constant 0 : index
    %4 = vector.load %arg3[%c0_5, %c0_6] : memref<1x256xf32, #tpu.memory_space<vmem>>, vector<1x256xf32>
    %5 = vector.broadcast %4 : vector<1x256xf32> to vector<8x256xf32>
    %6 = arith.addf %3, %5 : vector<8x256xf32>
    %c0_7 = arith.constant 0 : index
    %c0_8 = arith.constant 0 : index
    %7 = vector.load %arg4[%c0_7, %c0_8] : memref<1x256xf32, #tpu.memory_space<vmem>>, vector<1x256xf32>
    %c0_9 = arith.constant 0 : index
    %c0_10 = arith.constant 0 : index
    %8 = vector.load %arg5[%c0_9, %c0_10] : memref<1x256xf32, #tpu.memory_space<vmem>>, vector<1x256xf32>
    %cst_11 = arith.constant dense<0.000000e+00> : vector<8xf32>
    %9 = vector.multi_reduction <add>, %6, %cst_11 [1] : vector<8x256xf32> to vector<8xf32>
    %10 = vector.shape_cast %9 : vector<8xf32> to vector<8x1xf32>
    %cst_12 = arith.constant 2.560000e+02 : f32
    %11 = vector.broadcast %cst_12 : f32 to vector<8x1xf32>
    %12 = arith.divf %10, %11 : vector<8x1xf32>
    %13 = vector.broadcast %12 : vector<8x1xf32> to vector<8x256xf32>
    %14 = arith.subf %6, %13 : vector<8x256xf32>
    %15 = arith.mulf %14, %14 : vector<8x256xf32>
    %cst_13 = arith.constant dense<0.000000e+00> : vector<8xf32>
    %16 = vector.multi_reduction <add>, %15, %cst_13 [1] : vector<8x256xf32> to vector<8xf32>
    %17 = vector.shape_cast %16 : vector<8xf32> to vector<8x1xf32>
    %cst_14 = arith.constant 2.560000e+02 : f32
    %18 = vector.broadcast %cst_14 : f32 to vector<8x1xf32>
    %19 = arith.divf %17, %18 : vector<8x1xf32>
    %20 = vector.broadcast %12 : vector<8x1xf32> to vector<8x256xf32>
    %21 = arith.subf %6, %20 : vector<8x256xf32>
    %cst_15 = arith.constant 9.99999974E-6 : f32
    %22 = vector.broadcast %cst_15 : f32 to vector<8x1xf32>
    %23 = arith.addf %19, %22 : vector<8x1xf32>
    %24 = math.rsqrt %23 : vector<8x1xf32>
    %25 = vector.broadcast %24 : vector<8x1xf32> to vector<8x256xf32>
    %26 = arith.mulf %21, %25 : vector<8x256xf32>
    %27 = vector.broadcast %7 : vector<1x256xf32> to vector<8x256xf32>
    %28 = arith.mulf %26, %27 : vector<8x256xf32>
    %29 = vector.broadcast %8 : vector<1x256xf32> to vector<8x256xf32>
    %30 = arith.addf %28, %29 : vector<8x256xf32>
    %c0_16 = arith.constant 0 : index
    %c0_17 = arith.constant 0 : index
    %31 = vector.load %arg7[%c0_16, %c0_17] : memref<4x64xf32, #tpu.memory_space<vmem>>, vector<4x64xf32>
    %c0_18 = arith.constant 0 : index
    %c0_19 = arith.constant 0 : index
    %c0_20 = arith.constant 0 : index
    %32 = vector.load %arg6[%c0_18, %c0_19, %c0_20] : memref<3x256x64xf32, #tpu.memory_space<vmem>>, vector<1x256x64xf32>
    %33 = vector.shape_cast %32 : vector<1x256x64xf32> to vector<256x64xf32>
    %cst_21 = arith.constant dense<0.000000e+00> : vector<8x64xf32>
    %34 = tpu.matmul %30, %33, %cst_21 {dimension_numbers = #tpu.dot_dimension_numbers<[1], [0], [0], [1], [0, 0, 1, 1], [], []>} : vector<8x256xf32>, vector<256x64xf32>, vector<8x64xf32> -> vector<8x64xf32>
    %35 = vector.extract_strided_slice %31 {offsets = [0, 0], sizes = [1, 64], strides = [1, 1]} : vector<4x64xf32> to vector<1x64xf32>
    %36 = vector.shape_cast %35 : vector<1x64xf32> to vector<64xf32>
    %37 = vector.shape_cast %36 : vector<64xf32> to vector<1x64xf32>
    %38 = vector.broadcast %37 : vector<1x64xf32> to vector<8x64xf32>
    %39 = arith.addf %34, %38 : vector<8x64xf32>
    %40 = arith.negf %39 : vector<8x64xf32>
    %41 = math.exp %40 : vector<8x64xf32>
    %cst_22 = arith.constant 1.000000e+00 : f32
    %42 = vector.broadcast %cst_22 : f32 to vector<8x64xf32>
    %43 = arith.addf %42, %41 : vector<8x64xf32>
    %44 = arith.divf %42, %43 : vector<8x64xf32>
    %c1 = arith.constant 1 : index
    %c0_23 = arith.constant 0 : index
    %c0_24 = arith.constant 0 : index
    %45 = vector.load %arg6[%c1, %c0_23, %c0_24] : memref<3x256x64xf32, #tpu.memory_space<vmem>>, vector<1x256x64xf32>
    %46 = vector.shape_cast %45 : vector<1x256x64xf32> to vector<256x64xf32>
    %cst_25 = arith.constant dense<0.000000e+00> : vector<8x64xf32>
    %47 = tpu.matmul %30, %46, %cst_25 {dimension_numbers = #tpu.dot_dimension_numbers<[1], [0], [0], [1], [0, 0, 1, 1], [], []>} : vector<8x256xf32>, vector<256x64xf32>, vector<8x64xf32> -> vector<8x64xf32>
    %48 = vector.extract_strided_slice %31 {offsets = [1, 0], sizes = [1, 64], strides = [1, 1]} : vector<4x64xf32> to vector<1x64xf32>
    %49 = vector.shape_cast %48 : vector<1x64xf32> to vector<64xf32>
    %50 = vector.shape_cast %49 : vector<64xf32> to vector<1x64xf32>
    %51 = vector.broadcast %50 : vector<1x64xf32> to vector<8x64xf32>
    %52 = arith.addf %47, %51 : vector<8x64xf32>
    %53 = arith.negf %52 : vector<8x64xf32>
    %54 = math.exp %53 : vector<8x64xf32>
    %cst_26 = arith.constant 1.000000e+00 : f32
    %55 = vector.broadcast %cst_26 : f32 to vector<8x64xf32>
    %56 = arith.addf %55, %54 : vector<8x64xf32>
    %57 = arith.divf %55, %56 : vector<8x64xf32>
    %c2 = arith.constant 2 : index
    %c0_27 = arith.constant 0 : index
    %c0_28 = arith.constant 0 : index
    %58 = vector.load %arg6[%c2, %c0_27, %c0_28] : memref<3x256x64xf32, #tpu.memory_space<vmem>>, vector<1x256x64xf32>
    %59 = vector.shape_cast %58 : vector<1x256x64xf32> to vector<256x64xf32>
    %cst_29 = arith.constant dense<0.000000e+00> : vector<8x64xf32>
    %60 = tpu.matmul %30, %59, %cst_29 {dimension_numbers = #tpu.dot_dimension_numbers<[1], [0], [0], [1], [0, 0, 1, 1], [], []>} : vector<8x256xf32>, vector<256x64xf32>, vector<8x64xf32> -> vector<8x64xf32>
    %61 = vector.extract_strided_slice %31 {offsets = [2, 0], sizes = [1, 64], strides = [1, 1]} : vector<4x64xf32> to vector<1x64xf32>
    %62 = vector.shape_cast %61 : vector<1x64xf32> to vector<64xf32>
    %63 = vector.shape_cast %62 : vector<64xf32> to vector<1x64xf32>
    %64 = vector.broadcast %63 : vector<1x64xf32> to vector<8x64xf32>
    %65 = arith.addf %60, %64 : vector<8x64xf32>
    %66 = vector.extract_strided_slice %31 {offsets = [3, 0], sizes = [1, 64], strides = [1, 1]} : vector<4x64xf32> to vector<1x64xf32>
    %67 = vector.shape_cast %66 : vector<1x64xf32> to vector<64xf32>
    %68 = vector.shape_cast %67 : vector<64xf32> to vector<1x64xf32>
    %69 = vector.broadcast %68 : vector<1x64xf32> to vector<8x64xf32>
    %70 = arith.mulf %44, %69 : vector<8x64xf32>
    %71 = arith.addf %65, %70 : vector<8x64xf32>
    %72 = math.tanh %71 : vector<8x64xf32>
    %cst_30 = arith.constant 1.000000e+00 : f32
    %73 = vector.broadcast %cst_30 : f32 to vector<8x64xf32>
    %74 = arith.subf %73, %57 : vector<8x64xf32>
    %75 = arith.mulf %74, %72 : vector<8x64xf32>
    %c0_31 = arith.constant 0 : index
    %c0_32 = arith.constant 0 : index
    %76 = vector.load %arg9[%c0_31, %c0_32] : memref<4x64xf32, #tpu.memory_space<vmem>>, vector<4x64xf32>
    %c0_33 = arith.constant 0 : index
    %c0_34 = arith.constant 0 : index
    %c0_35 = arith.constant 0 : index
    %77 = vector.load %arg8[%c0_33, %c0_34, %c0_35] : memref<3x64x64xf32, #tpu.memory_space<vmem>>, vector<1x64x64xf32>
    %78 = vector.shape_cast %77 : vector<1x64x64xf32> to vector<64x64xf32>
    %cst_36 = arith.constant dense<0.000000e+00> : vector<8x64xf32>
    %79 = tpu.matmul %75, %78, %cst_36 {dimension_numbers = #tpu.dot_dimension_numbers<[1], [0], [0], [1], [0, 0, 1, 1], [], []>} : vector<8x64xf32>, vector<64x64xf32>, vector<8x64xf32> -> vector<8x64xf32>
    %80 = vector.extract_strided_slice %76 {offsets = [0, 0], sizes = [1, 64], strides = [1, 1]} : vector<4x64xf32> to vector<1x64xf32>
    %81 = vector.shape_cast %80 : vector<1x64xf32> to vector<64xf32>
    %82 = vector.shape_cast %81 : vector<64xf32> to vector<1x64xf32>
    %83 = vector.broadcast %82 : vector<1x64xf32> to vector<8x64xf32>
    %84 = arith.addf %79, %83 : vector<8x64xf32>
    %85 = arith.negf %84 : vector<8x64xf32>
    %86 = math.exp %85 : vector<8x64xf32>
    %cst_37 = arith.constant 1.000000e+00 : f32
    %87 = vector.broadcast %cst_37 : f32 to vector<8x64xf32>
    %88 = arith.addf %87, %86 : vector<8x64xf32>
    %89 = arith.divf %87, %88 : vector<8x64xf32>
    %c1_38 = arith.constant 1 : index
    %c0_39 = arith.constant 0 : index
    %c0_40 = arith.constant 0 : index
    %90 = vector.load %arg8[%c1_38, %c0_39, %c0_40] : memref<3x64x64xf32, #tpu.memory_space<vmem>>, vector<1x64x64xf32>
    %91 = vector.shape_cast %90 : vector<1x64x64xf32> to vector<64x64xf32>
    %cst_41 = arith.constant dense<0.000000e+00> : vector<8x64xf32>
    %92 = tpu.matmul %75, %91, %cst_41 {dimension_numbers = #tpu.dot_dimension_numbers<[1], [0], [0], [1], [0, 0, 1, 1], [], []>} : vector<8x64xf32>, vector<64x64xf32>, vector<8x64xf32> -> vector<8x64xf32>
    %93 = vector.extract_strided_slice %76 {offsets = [1, 0], sizes = [1, 64], strides = [1, 1]} : vector<4x64xf32> to vector<1x64xf32>
    %94 = vector.shape_cast %93 : vector<1x64xf32> to vector<64xf32>
    %95 = vector.shape_cast %94 : vector<64xf32> to vector<1x64xf32>
    %96 = vector.broadcast %95 : vector<1x64xf32> to vector<8x64xf32>
    %97 = arith.addf %92, %96 : vector<8x64xf32>
    %98 = arith.negf %97 : vector<8x64xf32>
    %99 = math.exp %98 : vector<8x64xf32>
    %cst_42 = arith.constant 1.000000e+00 : f32
    %100 = vector.broadcast %cst_42 : f32 to vector<8x64xf32>
    %101 = arith.addf %100, %99 : vector<8x64xf32>
    %102 = arith.divf %100, %101 : vector<8x64xf32>
    %c2_43 = arith.constant 2 : index
    %c0_44 = arith.constant 0 : index
    %c0_45 = arith.constant 0 : index
    %103 = vector.load %arg8[%c2_43, %c0_44, %c0_45] : memref<3x64x64xf32, #tpu.memory_space<vmem>>, vector<1x64x64xf32>
    %104 = vector.shape_cast %103 : vector<1x64x64xf32> to vector<64x64xf32>
    %cst_46 = arith.constant dense<0.000000e+00> : vector<8x64xf32>
    %105 = tpu.matmul %75, %104, %cst_46 {dimension_numbers = #tpu.dot_dimension_numbers<[1], [0], [0], [1], [0, 0, 1, 1], [], []>} : vector<8x64xf32>, vector<64x64xf32>, vector<8x64xf32> -> vector<8x64xf32>
    %106 = vector.extract_strided_slice %76 {offsets = [2, 0], sizes = [1, 64], strides = [1, 1]} : vector<4x64xf32> to vector<1x64xf32>
    %107 = vector.shape_cast %106 : vector<1x64xf32> to vector<64xf32>
    %108 = vector.shape_cast %107 : vector<64xf32> to vector<1x64xf32>
    %109 = vector.broadcast %108 : vector<1x64xf32> to vector<8x64xf32>
    %110 = arith.addf %105, %109 : vector<8x64xf32>
    %111 = vector.extract_strided_slice %76 {offsets = [3, 0], sizes = [1, 64], strides = [1, 1]} : vector<4x64xf32> to vector<1x64xf32>
    %112 = vector.shape_cast %111 : vector<1x64xf32> to vector<64xf32>
    %113 = vector.shape_cast %112 : vector<64xf32> to vector<1x64xf32>
    %114 = vector.broadcast %113 : vector<1x64xf32> to vector<8x64xf32>
    %115 = arith.mulf %89, %114 : vector<8x64xf32>
    %116 = arith.addf %110, %115 : vector<8x64xf32>
    %117 = math.tanh %116 : vector<8x64xf32>
    %cst_47 = arith.constant 1.000000e+00 : f32
    %118 = vector.broadcast %cst_47 : f32 to vector<8x64xf32>
    %119 = arith.subf %118, %102 : vector<8x64xf32>
    %120 = arith.mulf %119, %117 : vector<8x64xf32>
    %c0_48 = arith.constant 0 : index
    %c0_49 = arith.constant 0 : index
    %121 = vector.load %arg10[%c0_48, %c0_49] : memref<1x64xf32, #tpu.memory_space<vmem>>, vector<1x64xf32>
    %c0_50 = arith.constant 0 : index
    %c0_51 = arith.constant 0 : index
    %122 = vector.load %arg11[%c0_50, %c0_51] : memref<1x64xf32, #tpu.memory_space<vmem>>, vector<1x64xf32>
    %cst_52 = arith.constant dense<0.000000e+00> : vector<8xf32>
    %123 = vector.multi_reduction <add>, %120, %cst_52 [1] : vector<8x64xf32> to vector<8xf32>
    %124 = vector.shape_cast %123 : vector<8xf32> to vector<8x1xf32>
    %cst_53 = arith.constant 6.400000e+01 : f32
    %125 = vector.broadcast %cst_53 : f32 to vector<8x1xf32>
    %126 = arith.divf %124, %125 : vector<8x1xf32>
    %127 = vector.broadcast %126 : vector<8x1xf32> to vector<8x64xf32>
    %128 = arith.subf %120, %127 : vector<8x64xf32>
    %129 = arith.mulf %128, %128 : vector<8x64xf32>
    %cst_54 = arith.constant dense<0.000000e+00> : vector<8xf32>
    %130 = vector.multi_reduction <add>, %129, %cst_54 [1] : vector<8x64xf32> to vector<8xf32>
    %131 = vector.shape_cast %130 : vector<8xf32> to vector<8x1xf32>
    %cst_55 = arith.constant 6.400000e+01 : f32
    %132 = vector.broadcast %cst_55 : f32 to vector<8x1xf32>
    %133 = arith.divf %131, %132 : vector<8x1xf32>
    %134 = vector.broadcast %126 : vector<8x1xf32> to vector<8x64xf32>
    %135 = arith.subf %120, %134 : vector<8x64xf32>
    %cst_56 = arith.constant 9.99999974E-6 : f32
    %136 = vector.broadcast %cst_56 : f32 to vector<8x1xf32>
    %137 = arith.addf %133, %136 : vector<8x1xf32>
    %138 = math.rsqrt %137 : vector<8x1xf32>
    %139 = vector.broadcast %138 : vector<8x1xf32> to vector<8x64xf32>
    %140 = arith.mulf %135, %139 : vector<8x64xf32>
    %141 = vector.broadcast %121 : vector<1x64xf32> to vector<8x64xf32>
    %142 = arith.mulf %140, %141 : vector<8x64xf32>
    %143 = vector.broadcast %122 : vector<1x64xf32> to vector<8x64xf32>
    %144 = arith.addf %142, %143 : vector<8x64xf32>
    %c0_57 = arith.constant 0 : index
    %c0_58 = arith.constant 0 : index
    %145 = vector.load %arg12[%c0_57, %c0_58] : memref<1x64xf32, #tpu.memory_space<vmem>>, vector<1x64xf32>
    %146 = vector.broadcast %145 : vector<1x64xf32> to vector<8x64xf32>
    %147 = arith.mulf %144, %146 : vector<8x64xf32>
    %cst_59 = arith.constant dense<0.000000e+00> : vector<8xf32>
    %148 = vector.multi_reduction <add>, %147, %cst_59 [1] : vector<8x64xf32> to vector<8xf32>
    %149 = vector.shape_cast %148 : vector<8xf32> to vector<1x8xf32>
    %c0_60 = arith.constant 0 : index
    %c0_61 = arith.constant 0 : index
    %150 = vector.load %arg13[%c0_60, %c0_61] : memref<1x1xf32, #tpu.memory_space<vmem>>, vector<1x1xf32>
    %151 = vector.broadcast %150 : vector<1x1xf32> to vector<1x8xf32>
    %152 = arith.addf %149, %151 : vector<1x8xf32>
    %c0_62 = arith.constant 0 : index
    %c0_63 = arith.constant 0 : index
    %153 = vector.load %arg14[%c0_62, %c0_63] : memref<1x8xf32, #tpu.memory_space<vmem>>, vector<1x8xf32>
    tpu.vector_store %arg14[%c0_62, %c0_63], %152 {strides = array<i32>} : memref<1x8xf32, #tpu.memory_space<vmem>>, vector<1x8xf32>,
    return
  }
  func.func @transform_0(%arg0: i32) -> (i32, i32, i32) {
    %c0_i32 = arith.constant 0 : i32
    %c0_i32_0 = arith.constant 0 : i32
    %c0_i32_1 = arith.constant 0 : i32
    return %arg0, %c0_i32, %c0_i32_0 : i32, i32, i32
  }
  func.func @transform_1(%arg0: i32) -> (i32, i32) {
    %c0_i32 = arith.constant 0 : i32
    %c0_i32_0 = arith.constant 0 : i32
    %c0_i32_1 = arith.constant 0 : i32
    return %c0_i32, %c0_i32_0 : i32, i32
  }
  func.func @transform_2(%arg0: i32) -> (i32, i32) {
    %c0_i32 = arith.constant 0 : i32
    %c0_i32_0 = arith.constant 0 : i32
    %c0_i32_1 = arith.constant 0 : i32
    return %c0_i32, %c0_i32_0 : i32, i32
  }
  func.func @transform_3(%arg0: i32) -> (i32, i32) {
    %c0_i32 = arith.constant 0 : i32
    %c0_i32_0 = arith.constant 0 : i32
    %c0_i32_1 = arith.constant 0 : i32
    return %c0_i32, %c0_i32_0 : i32, i32
  }
  func.func @transform_4(%arg0: i32) -> (i32, i32) {
    %c0_i32 = arith.constant 0 : i32
    %c0_i32_0 = arith.constant 0 : i32
    %c0_i32_1 = arith.constant 0 : i32
    return %c0_i32, %c0_i32_0 : i32, i32
  }
  func.func @transform_5(%arg0: i32) -> (i32, i32, i32) {
    %c0_i32 = arith.constant 0 : i32
    %c0_i32_0 = arith.constant 0 : i32
    %c0_i32_1 = arith.constant 0 : i32
    %c0_i32_2 = arith.constant 0 : i32
    return %c0_i32, %c0_i32_0, %c0_i32_1 : i32, i32, i32
  }
  func.func @transform_6(%arg0: i32) -> (i32, i32) {
    %c0_i32 = arith.constant 0 : i32
    %c0_i32_0 = arith.constant 0 : i32
    %c0_i32_1 = arith.constant 0 : i32
    return %c0_i32, %c0_i32_0 : i32, i32
  }
  func.func @transform_7(%arg0: i32) -> (i32, i32, i32) {
    %c0_i32 = arith.constant 0 : i32
    %c0_i32_0 = arith.constant 0 : i32
    %c0_i32_1 = arith.constant 0 : i32
    %c0_i32_2 = arith.constant 0 : i32
    return %c0_i32, %c0_i32_0, %c0_i32_1 : i32, i32, i32
  }
  func.func @transform_8(%arg0: i32) -> (i32, i32) {
    %c0_i32 = arith.constant 0 : i32
    %c0_i32_0 = arith.constant 0 : i32
    %c0_i32_1 = arith.constant 0 : i32
    return %c0_i32, %c0_i32_0 : i32, i32
  }
  func.func @transform_9(%arg0: i32) -> (i32, i32) {
    %c0_i32 = arith.constant 0 : i32
    %c0_i32_0 = arith.constant 0 : i32
    %c0_i32_1 = arith.constant 0 : i32
    return %c0_i32, %c0_i32_0 : i32, i32
  }
  func.func @transform_10(%arg0: i32) -> (i32, i32) {
    %c0_i32 = arith.constant 0 : i32
    %c0_i32_0 = arith.constant 0 : i32
    %c0_i32_1 = arith.constant 0 : i32
    return %c0_i32, %c0_i32_0 : i32, i32
  }
  func.func @transform_11(%arg0: i32) -> (i32, i32) {
    %c0_i32 = arith.constant 0 : i32
    %c0_i32_0 = arith.constant 0 : i32
    %c0_i32_1 = arith.constant 0 : i32
    return %c0_i32, %c0_i32_0 : i32, i32
  }
  func.func @transform_12(%arg0: i32) -> (i32, i32) {
    %c0_i32 = arith.constant 0 : i32
    %c0_i32_0 = arith.constant 0 : i32
    %c0_i32_1 = arith.constant 0 : i32
    return %c0_i32, %c0_i32_0 : i32, i32
  }
  func.func @transform_13(%arg0: i32) -> (i32, i32) {
    %c0_i32 = arith.constant 0 : i32
    %c0_i32_0 = arith.constant 0 : i32
    return %arg0, %c0_i32 : i32, i32
  }
}

</mosaic_0001>

<bundles_post_ra>
// kernel: tpu_custom_call.1
= control target key start
LH: loop header
LB: loop body
LE: loop exit
PB: predicated region body
PF: predicated region fallthrough
CT: control target
= control target key end

     0   :  { %s2307_s0 = inlined_call_operand.vmem [shape: f32[8,32,128], index: 0, kind: input, shape index: {}]   ;;  %s2308_s1 = inlined_call_operand.vmem [shape: f32[128,256], index: 1, kind: input, shape index: {}]   ;;  %s2309_s2 = inlined_call_operand.vmem [shape: f32[1,256], index: 2, kind: input, shape index: {}]   ;;  %s2310_s3 = inlined_call_operand.vmem [shape: f32[1,256], index: 3, kind: input, shape index: {}]   ;;  %s2311_s4 = inlined_call_operand.vmem [shape: f32[1,256], index: 4, kind: input, shape index: {}]   ;;  %s2312_s5 = inlined_call_operand.vmem [shape: f32[3,256,64], index: 5, kind: input, shape index: {}]   ;;  %s2313_s6 = inlined_call_operand.vmem [shape: f32[4,64], index: 6, kind: input, shape index: {}]   ;;  %s2314_s7 = inlined_call_operand.vmem [shape: f32[3,64,64], index: 7, kind: input, shape index: {}]   ;;  %s2315_s8 = inlined_call_operand.vmem [shape: f32[4,64], index: 8, kind: input, shape index: {}]   ;;  %s2316_s9 = inlined_call_operand.vmem [shape: f32[1,64], index: 9, kind: input, shape index: {}]   ;;  %s2317_s10 = inlined_call_operand.vmem [shape: f32[1,64], index: 10, kind: input, shape index: {}]   ;;  %s2318_s11 = inlined_call_operand.vmem [shape: f32[1,64], index: 11, kind: input, shape index: {}]   ;;  %s2319_s12 = inlined_call_operand.<no memory space> [shape: f32[1,1], index: 12, kind: input, shape index: {}]   ;;  %s2320_s13 = inlined_call_operand.hbm [shape: f32[1,8], index: 13, kind: output, shape index: {}]  }
   0x1   :  { %v18_v0 = vstv %s2319_s12 }
   0x2   :  { %19 = vst [vmem:[#allocation2] sm:$0x1] %v18_v0 }
   0x3   :  { %v152_v1 = vld [vmem:[%s2308_s1 + $0x8] sm:$0xff]  ;;  %v154_v2 = vld [vmem:[%s2308_s1 + $0x18] sm:$0xff]  ;;  %v151_v3 = vld [vmem:[%s2308_s1] sm:$0xff]  ;;  %v1524_v8 = vmov 0.0   ;;  %vm203_vm0 = vcmask 1041409   ;;  %vm205_vm1 = vcmask 1042434  }
   0x4   :  { %v1305_v4 = vpack.c.bf16 %v154_v2, %v152_v1  ;;  %v153_v5 = vld [vmem:[%s2308_s1 + $0x10] sm:$0xff]  ;;  %v156_v6 = vld [vmem:[%s2308_s1 + $0x28] sm:$0xff]  ;;  %v158_v7 = vld [vmem:[%s2308_s1 + $0x38] sm:$0xff]  ;;  %282 = vmatprep.mubr.f32.mxu0 %v1524_v8 }
   0x5   :  { %v1307_v9 = vpack.c.bf16 %v153_v5, %v151_v3  ;;  %v1309_v10 = vpack.c.bf16 %v158_v7, %v156_v6  ;;  %v155_v11 = vld [vmem:[%s2308_s1 + $0x20] sm:$0xff]  ;;  %v157_v12 = vld [vmem:[%s2308_s1 + $0x30] sm:$0xff]  ;;  %v160_v13 = vld [vmem:[%s2308_s1 + $0x48] sm:$0xff] }
   0x6   :  { %1306 = vmatprep.subr.bf16.mxu0 %v1305_v4  ;;  %v162_v14 = vld [vmem:[%s2308_s1 + $0x58] sm:$0xff]  ;;  %v1311_v15 = vpack.c.bf16 %v157_v12, %v155_v11  ;;  %v159_v17 = vld [vmem:[%s2308_s1 + $0x40] sm:$0xff]  ;;  %v161_v18 = vld [vmem:[%s2308_s1 + $0x50] sm:$0xff] }
   0x7   :  { %1308 = vmatpush1.bf16.msra.mxu0 %v1307_v9  ;;  %v1313_v16 = vpack.c.bf16 %v162_v14, %v160_v13  ;;  %v164_v19 = vld [vmem:[%s2308_s1 + $0x68] sm:$0xff]  ;;  %v166_v20 = vld [vmem:[%s2308_s1 + $0x78] sm:$0xff]  ;;  %v1315_v21 = vpack.c.bf16 %v161_v18, %v159_v17  ;;  %v163_v22 = vld [vmem:[%s2308_s1 + $0x60] sm:$0xff] }
   0x8   :  { %1310 = vmatprep.subr.bf16.mxu0 %v1309_v10  ;;  %v1317_v23 = vpack.c.bf16 %v166_v20, %v164_v19  ;;  %v165_v24 = vld [vmem:[%s2308_s1 + $0x70] sm:$0xff]  ;;  %v168_v25 = vld [vmem:[%s2308_s1 + $0x88] sm:$0xff]  ;;  %v170_v26 = vld [vmem:[%s2308_s1 + $0x98] sm:$0xff] }
   0x9   :  { %v1660_v27 = vld [vmem:[%s2308_s1 + $0x80] sm:$0xff]  ;;  %v1665_v28 = vld [vmem:[%s2308_s1 + $0x90] sm:$0xff]  ;;  %v1670_v29 = vld [vmem:[%s2308_s1 + $0xa8] sm:$0xff]  ;;  %v1319_v36 = vpack.c.bf16 %v165_v24, %v163_v22  ;;  %v1321_v45 = vpack.c.bf16 %v170_v26, %v168_v25 }
   0xa   :  { %v1675_v30 = vld [vmem:[%s2308_s1 + $0xb8] sm:$0xff]  ;;  %v47_v31 = vld [vmem:[%s2307_s0] sm:$0xff]  ;;  %v1688_v33 = vld [vmem:[%s2308_s1 + $0xb0] sm:$0xff]  ;;  %v1323_v59 = vpack.c.bf16 %v1665_v28, %v1660_v27 }
   0xb   :  { %1312 = vmatpush1.bf16.msra.mxu0 %v1311_v15  ;;  %v1683_v32 = vld [vmem:[%s2308_s1 + $0xa0] sm:$0xff]  ;;  %v48_v34 = vld [vmem:[%s2307_s0 + $0x8] sm:$0xff]  ;;  %v49_v35 = vld [vmem:[%s2307_s0 + $0x10] sm:$0xff]  ;;  %v1325_v60 = vpack.c.bf16 %v1675_v30, %v1670_v29 }
   0xc   :  { %1314 = vmatprep.subr.bf16.mxu0 %v1313_v16  ;;  %v1699_v37 = vld [vmem:[%s2308_s1 + $0xc8] sm:$0xff]  ;;  %v1704_v38 = vld [vmem:[%s2308_s1 + $0xd8] sm:$0xff]  ;;  %v1709_v39 = vld [vmem:[%s2308_s1 + $0xc0] sm:$0xff]  ;;  %v79_v44 = vadd.f32 %v48_v34, %v47_v31  ;;  %v1327_v1 = vpack.c.bf16 %v1688_v33, %v1683_v32 }
   0xd   :  { %v1714_v40 = vld [vmem:[%s2308_s1 + $0xd0] sm:$0xff]  ;;  %v51_v41 = vld [vmem:[%s2307_s0 + $0x20] sm:$0xff]  ;;  %v52_v42 = vld [vmem:[%s2307_s0 + $0x28] sm:$0xff]  ;;  %v1329_v9 = vpack.c.bf16 %v1704_v38, %v1699_v37 }
   0xe   :  { %v53_v43 = vld [vmem:[%s2307_s0 + $0x30] sm:$0xff]  ;;  %v50_v46 = vld [vmem:[%s2307_s0 + $0x18] sm:$0xff]  ;;  %v55_v47 = vld [vmem:[%s2307_s0 + $0x40] sm:$0xff]  ;;  %v88_v49 = vadd.f32 %v52_v42, %v51_v41  ;;  %v80_v57 = vadd.f32 %v79_v44, %v49_v35  ;;  %v1331_v10 = vpack.c.bf16 %v1714_v40, %v1709_v39 }
   0xf   :  { %1316 = vmatpush1.bf16.msra.mxu0 %v1315_v21  ;;  %v56_v48 = vld [vmem:[%s2307_s0 + $0x48] sm:$0xff]  ;;  %v1742_v51 = vld [vmem:[%s2308_s1 + $0xf8] sm:$0xff]  ;;  %v1747_v52 = vld [vmem:[%s2308_s1 + $0xe0] sm:$0xff] }
  0x10   :  { %1318 = vmatprep.subr.bf16.mxu0 %v1317_v23  ;;  %v1737_v50 = vld [vmem:[%s2308_s1 + $0xe8] sm:$0xff]  ;;  %v1752_v53 = vld [vmem:[%s2308_s1 + $0xf0] sm:$0xff]  ;;  %v54_v54 = vld [vmem:[%s2307_s0 + $0x38] sm:$0xff]  ;;  %v97_v58 = vadd.f32 %v56_v48, %v55_v47  ;;  %v89_v0 = vadd.f32 %v88_v49, %v53_v43  ;;  %v81_v5 = vadd.f32 %v80_v57, %v50_v46 }
  0x11   :  { %v57_v55 = vld [vmem:[%s2307_s0 + $0x50] sm:$0xff]  ;;  %v59_v56 = vld [vmem:[%s2307_s0 + $0x60] sm:$0xff]  ;;  %v58_v61 = vld [vmem:[%s2307_s0 + $0x58] sm:$0xff]  ;;  %v1333_v23 = vpack.c.bf16 %v1742_v51, %v1737_v50  ;;  %v1335_v24 = vpack.c.bf16 %v1752_v53, %v1747_v52 }
  0x12   :  { %v60_v62 = vld [vmem:[%s2307_s0 + $0x68] sm:$0xff]  ;;  %v61_v63 = vld [vmem:[%s2307_s0 + $0x70] sm:$0xff]  ;;  %v63_v2 = vld [vmem:[%s2307_s0 + $0x80] sm:$0xff]  ;;  %v98_v6 = vadd.f32 %v97_v58, %v57_v55  ;;  %v90_v14 = vadd.f32 %v89_v0, %v54_v54  ;;  %v82_v19 = vrot.slane %v81_v5, 4 }
  0x13   :  { %1320 = vmatpush1.bf16.msra.mxu0 %v1319_v36  ;;  %v64_v3 = vld [vmem:[%s2307_s0 + $0x88] sm:$0xff]  ;;  %v65_v4 = vld [vmem:[%s2307_s0 + $0x90] sm:$0xff]  ;;  %v106_v7 = vadd.f32 %v60_v62, %v59_v56  ;;  %v62_v11 = vld [vmem:[%s2307_s0 + $0x78] sm:$0xff] }
  0x14   :  { %1322 = vmatprep.subr.bf16.mxu0 %v1321_v45  ;;  %v67_v12 = vld [vmem:[%s2307_s0 + $0xa0] sm:$0xff]  ;;  %v68_v13 = vld [vmem:[%s2307_s0 + $0xa8] sm:$0xff]  ;;  %v115_v15 = vadd.f32 %v64_v3, %v63_v2  ;;  %v66_v16 = vld [vmem:[%s2307_s0 + $0x98] sm:$0xff]  ;;  %v99_v20 = vadd.f32 %v98_v6, %v58_v61  ;;  %v91_v28 = vrot.slane %v90_v14, 4  ;;  %v83_v33 = vadd.f32 %v82_v19, %v81_v5 }
  0x15   :  { %v69_v17 = vld [vmem:[%s2307_s0 + $0xb0] sm:$0xff]  ;;  %v71_v18 = vld [vmem:[%s2307_s0 + $0xc0] sm:$0xff]  ;;  %v107_v21 = vadd.f32 %v106_v7, %v61_v63  ;;  %v124_v22 = vadd.f32 %v68_v13, %v67_v12  ;;  %v70_v25 = vld [vmem:[%s2307_s0 + $0xb8] sm:$0xff] }
  0x16   :  { %v72_v26 = vld [vmem:[%s2307_s0 + $0xc8] sm:$0xff]  ;;  %v73_v27 = vld [vmem:[%s2307_s0 + $0xd0] sm:$0xff]  ;;  %v116_v29 = vadd.f32 %v115_v15, %v65_v4  ;;  %v75_v30 = vld [vmem:[%s2307_s0 + $0xe0] sm:$0xff]  ;;  %v100_v34 = vrot.slane %v99_v20, 4  ;;  %v92_v37 = vadd.f32 %v91_v28, %v90_v14 }
  0x17   :  { %1324 = vmatpush1.bf16.msra.mxu0 %v1323_v59  ;;  %v76_v31 = vld [vmem:[%s2307_s0 + $0xe8] sm:$0xff]  ;;  %v77_v32 = vld [vmem:[%s2307_s0 + $0xf0] sm:$0xff]  ;;  %v108_v35 = vadd.f32 %v107_v21, %v62_v11  ;;  %v125_v36 = vadd.f32 %v124_v22, %v69_v17  ;;  %v133_v41 = vadd.f32 %v72_v26, %v71_v18 }
  0x18   :  { %1326 = vmatprep.subr.bf16.mxu0 %v1325_v60  ;;  %v117_v38 = vadd.f32 %v116_v29, %v66_v16  ;;  %v142_v42 = vadd.f32 %v76_v31, %v75_v30 }
  0x19   :  { %20 = vsyncpa [#allocation4], 0  ;;  %v74_v43 = vld [vmem:[%s2307_s0 + $0xd8] sm:$0xff]  ;;  %v84_v45 = vrot.slane %v83_v33, 2  ;;  %v101_v46 = vadd.f32 %v100_v34, %v99_v20  ;;  %v109_v47 = vrot.slane %v108_v35, 4  ;;  %v126_v48 = vadd.f32 %v125_v36, %v70_v25 }
  0x1a   :  { %v78_v44 = vld [vmem:[%s2307_s0 + $0xf8] sm:$0xff]  ;;  %v93_v49 = vrot.slane %v92_v37, 2  ;;  %v118_v50 = vrot.slane %v117_v38, 4  ;;  %v134_v51 = vadd.f32 %v133_v41, %v73_v27  ;;  %v143_v54 = vadd.f32 %v142_v42, %v77_v32 }
  0x1b   :  { %1328 = vmatpush1.bf16.msra.mxu0 %v1327_v1  ;;  %v85_v55 = vadd.f32 %v84_v45, %v83_v33  ;;  %v102_v56 = vrot.slane %v101_v46, 2  ;;  %v110_v57 = vadd.f32 %v109_v47, %v108_v35  ;;  %v127_v58 = vrot.slane %v126_v48, 4 }
  0x1c   :  { %1330 = vmatprep.subr.bf16.mxu0 %v1329_v9  ;;  %v94_v59 = vadd.f32 %v93_v49, %v92_v37  ;;  %v119_v60 = vadd.f32 %v118_v50, %v117_v38  ;;  %v135_v61 = vadd.f32 %v134_v51, %v74_v43  ;;  %v144_v62 = vadd.f32 %v143_v54, %v78_v44  ;;  %v183_v38 = vld [vmem:[%s2309_s2] sm:$0x3]  ;;  %v352_v50 = vld [vmem:[%s2312_s5 + $0x88] sm:$0xff] }
  0x1d   :  { %v86_v63 = vrot.slane %v85_v55, 1  ;;  %v103_v0 = vadd.f32 %v102_v56, %v101_v46  ;;  %v111_v2 = vrot.slane %v110_v57, 2  ;;  %v128_v3 = vadd.f32 %v127_v58, %v126_v48  ;;  %v351_v49 = vld [vmem:[%s2312_s5 + $0x80] sm:$0xff] }
  0x1e   :  { %v95_v4 = vrot.slane %v94_v59, 1  ;;  %v120_v5 = vrot.slane %v119_v60, 2  ;;  %v136_v6 = vrot.slane %v135_v61, 4  ;;  %v145_v7 = vrot.slane %v144_v62, 4  ;;  %v335_v51 = vld [vmem:[%s2312_s5] sm:$0xff] }
  0x1f   :  { %1332 = vmatpush1.bf16.msra.mxu0 %v1331_v10  ;;  %v87_v1 = vadd.f32 %v86_v63, %v85_v55  ;;  %v104_v11 = vrot.slane %v103_v0, 1  ;;  %v112_v12 = vadd.f32 %v111_v2, %v110_v57  ;;  %v129_v9 = vrot.slane %v128_v3, 2  ;;  %v336_v55 = vld [vmem:[%s2312_s5 + $0x8] sm:$0xff]  ;;  %v1043_v56 = vld [vmem:[%s2312_s5 + $0x180] sm:$0xff]  ;;  %v337_v2 = vld [vmem:[%s2312_s5 + $0x10] sm:$0xff] }
  0x20   :  { %1334 = vmatprep.subr.bf16.mxu0 %v1333_v23  ;;  %v96_v13 = vadd.f32 %v95_v4, %v94_v59  ;;  %v121_v14 = vadd.f32 %v120_v5, %v119_v60  ;;  %v137_v15 = vadd.f32 %v136_v6, %v135_v61  ;;  %v146_v16 = vadd.f32 %v145_v7, %v144_v62  ;;  %v1044_v57 = vld [vmem:[%s2312_s5 + $0x188] sm:$0xff]  ;;  %v1027_v60 = vld [vmem:[%s2312_s5 + $0x100] sm:$0xff]  ;;  %v353_v62 = vld [vmem:[%s2312_s5 + $0x90] sm:$0xff] }
  0x21   :  { %v105_v17 = vadd.f32 %v104_v11, %v103_v0  ;;  %v113_v18 = vrot.slane %v112_v12, 1  ;;  %v130_v19 = vadd.f32 %v129_v9, %v128_v3  ;;  %vm207_vm2 = vcmask 1043459   ;;  %v1028_v61 = vld [vmem:[%s2312_s5 + $0x108] sm:$0xff]  ;;  %v354_v0 = vld [vmem:[%s2312_s5 + $0x98] sm:$0xff]  ;;  %v1045_v6 = vld [vmem:[%s2312_s5 + $0x190] sm:$0xff] }
  0x22   :  { %v122_v20 = vrot.slane %v121_v14, 1  ;;  %v138_v21 = vrot.slane %v137_v15, 2  ;;  %v147_v22 = vrot.slane %v146_v16, 2  ;;  %v204_v25 = vsel %vm203_vm0, %v96_v13, %v87_v1  ;;  %v338_v3 = vld [vmem:[%s2312_s5 + $0x18] sm:$0xff]  ;;  %v1029_v1 = vld [vmem:[%s2312_s5 + $0x110] sm:$0xff]  ;;  %v355_v9 = vld [vmem:[%s2312_s5 + $0xa0] sm:$0xff] }
  0x23   :  { %1336 = vmatpush1.bf16.msra.mxu0 %v1335_v24  ;;  %v114_v39 = vadd.f32 %v113_v18, %v112_v12  ;;  %v131_v40 = vrot.slane %v130_v19, 1  ;;  %v206_v10 = vsel %vm205_vm1, %v105_v17, %v204_v25  ;;  %vm209_vm3 = vcmask 1044484   ;;  %v1046_v7 = vld [vmem:[%s2312_s5 + $0x198] sm:$0xff]  ;;  %v356_v13 = vld [vmem:[%s2312_s5 + $0xa8] sm:$0xff]  ;;  %v1047_v18 = vld [vmem:[%s2312_s5 + $0x1a0] sm:$0xff] }
  0x24   :  { %v123_v23 = vadd.f32 %v122_v20, %v121_v14  ;;  %v139_v26 = vadd.f32 %v138_v21, %v137_v15  ;;  %v148_v27 = vadd.f32 %v147_v22, %v146_v16  ;;  %vm211_vm4 = vcmask 1045509   ;;  %v1030_v12 = vld [vmem:[%s2312_s5 + $0x118] sm:$0xff]  ;;  %v339_v16 = vld [vmem:[%s2312_s5 + $0x20] sm:$0xff]  ;;  %v340_v17 = vld [vmem:[%s2312_s5 + $0x28] sm:$0xff] }
  0x25   :  { %v132_v28 = vadd.f32 %v131_v40, %v130_v19  ;;  %v208_v29 = vsel %vm207_vm2, %v114_v39, %v206_v10  ;;  %vm213_vm5 = vcmask 1046534   ;;  %vm215_vm6 = vcmask 1047559   ;;  %v1048_v19 = vld [vmem:[%s2312_s5 + $0x1a8] sm:$0xff]  ;;  %v1031_v20 = vld [vmem:[%s2312_s5 + $0x120] sm:$0xff] }
  0x26   :  { %v140_v30 = vrot.slane %v139_v26, 1  ;;  %v149_v31 = vrot.slane %v148_v27, 1  ;;  %v210_v32 = vsel %vm209_vm3, %v123_v23, %v208_v29  ;;  %v185_v24 = vlaneseq  ;;  %v1032_v21 = vld [vmem:[%s2312_s5 + $0x128] sm:$0xff] }
  0x27   :  { %v212_v33 = vsel %vm211_vm4, %v132_v28, %v210_v32  ;;  %v1337_v54 = vpack.c.bf16 %v352_v50, %v351_v49  ;;  %v1339_v58 = vpack.c.bf16 %v336_v55, %v335_v51  ;;  %v1369_v59 = vpack.c.bf16 %v1044_v57, %v1043_v56  ;;  %v344_v49 = vld [vmem:[%s2312_s5 + $0x48] sm:$0xff]  ;;  %v1051_v50 = vld [vmem:[%s2312_s5 + $0x1c0] sm:$0xff] }
  0x28   :  { %v141_v34 = vadd.f32 %v140_v30, %v139_v26  ;;  %v150_v35 = vadd.f32 %v149_v31, %v148_v27  ;;  %v1846_v36 = vshrl.u32 %v185_v24, 7  ;;  %v1371_v63 = vpack.c.bf16 %v1028_v61, %v1027_v60  ;;  %v357_v30 = vld [vmem:[%s2312_s5 + $0xb0] sm:$0xff]  ;;  %v358_v31 = vld [vmem:[%s2312_s5 + $0xb8] sm:$0xff]  ;;  %v1035_v55 = vld [vmem:[%s2312_s5 + $0x140] sm:$0xff] }
  0x29   :  { %1338 = vmatprep.subr.bf16.mxu1 %v1337_v54  ;;  %1370 = vmatprep.subr.bf16.mxu0 %v1369_v59  ;;  %v1341_v4 = vpack.c.bf16 %v354_v0, %v353_v62  ;;  %v1343_v5 = vpack.c.bf16 %v338_v3, %v337_v2  ;;  %v1373_v11 = vpack.c.bf16 %v1046_v7, %v1045_v6  ;;  %v1052_v54 = vld [vmem:[%s2312_s5 + $0x1c8] sm:$0xff]  ;;  %v361_v59 = vld [vmem:[%s2312_s5 + $0xd0] sm:$0xff]  ;;  %v362_v60 = vld [vmem:[%s2312_s5 + $0xd8] sm:$0xff]  ;;  %vm1526_vm7 = vmmov 0  }
  0x2a   :  { %v214_v52 = vsel %vm213_vm5, %v141_v34, %v212_v33  ;;  %v1849_v37 = vsub.s32 0, %v1846_v36  ;;  %v1855_v41 = vsub.s32 1, %v1846_v36  ;;  %1340 = vmatpush3.bf16.msra.mxu1 %v1339_v58  ;;  %v1375_v14 = vpack.c.bf16 %v1030_v12, %v1029_v1  ;;  %v341_v33 = vld [vmem:[%s2312_s5 + $0x30] sm:$0xff]  ;;  %v342_v34 = vld [vmem:[%s2312_s5 + $0x38] sm:$0xff]  ;;  %v1036_v56 = vld [vmem:[%s2312_s5 + $0x148] sm:$0xff] }
  0x2b   :  { %v216_v53 = vsel %vm215_vm6, %v150_v35, %v214_v52  ;;  %1342 = vmatprep.subr.bf16.mxu1 %v1341_v4  ;;  %v1345_v15 = vpack.c.bf16 %v356_v13, %v355_v9  ;;  %v1347_v22 = vpack.c.bf16 %v340_v17, %v339_v16  ;;  %v1377_v25 = vpack.c.bf16 %v1048_v19, %v1047_v18  ;;  %v1049_v35 = vld [vmem:[%s2312_s5 + $0x1b0] sm:$0xff]  ;;  %v1054_v2 = vld [vmem:[%s2312_s5 + $0x1d8] sm:$0xff]  ;;  %v363_v7 = vld [vmem:[%s2312_s5 + $0xe0] sm:$0xff] }
  0x2c   :  { %283 = vmatmul.mubr.f32.vlgmr.msra.gmra.mrb[0].mxu0 %v216_v53  ;;  %v188_v42 = vrot.slane %v183_v38, %v1849_v37  ;;  %v192_v43 = vrot.slane %v183_v38, %v1855_v41  ;;  %v1379_v39 = vpack.c.bf16 %v1032_v21, %v1031_v20  ;;  %v1349_v32 = vpack.c.bf16 %v358_v31, %v357_v30  ;;  %v1050_v53 = vld [vmem:[%s2312_s5 + $0x1b8] sm:$0xff]  ;;  %v1033_v38 = vld [vmem:[%s2312_s5 + $0x130] sm:$0xff]  ;;  %v347_v12 = vld [vmem:[%s2312_s5 + $0x60] sm:$0xff] }
  0x2d   :  { %1372 = vmatpush3.bf16.msra.mxu0 %v1371_v63  ;;  %v1351_v52 = vpack.c.bf16 %v342_v34, %v341_v33  ;;  %v1385_v57 = vpack.c.bf16 %v1052_v54, %v1051_v50  ;;  %v1387_v58 = vpack.c.bf16 %v1036_v56, %v1035_v55  ;;  %v345_v61 = vld [vmem:[%s2312_s5 + $0x50] sm:$0xff]  ;;  %v1357_v62 = vpack.c.bf16 %v362_v60, %v361_v59  ;;  %v346_v63 = vld [vmem:[%s2312_s5 + $0x58] sm:$0xff]  ;;  %v348_v9 = vld [vmem:[%s2312_s5 + $0x68] sm:$0xff] }
  0x2e   :  { %1374 = vmatprep.subr.bf16.mxu0 %v1373_v11  ;;  %1344 = vmatpush3.bf16.msra.mxu1 %v1343_v5  ;;  %v1053_v0 = vld [vmem:[%s2312_s5 + $0x1d0] sm:$0xff]  ;;  %v1359_v3 = vpack.c.bf16 %v346_v63, %v345_v61  ;;  %v1038_v6 = vld [vmem:[%s2312_s5 + $0x158] sm:$0xff]  ;;  %v364_v11 = vld [vmem:[%s2312_s5 + $0xe8] sm:$0xff]  ;;  %v1363_v17 = vpack.c.bf16 %v348_v9, %v347_v12  ;;  %vm689_vm8 = vcmask 523264   ;;  %vm1010_vm9 = vcmask 57344  }
  0x2f   :  { %1346 = vmatprep.subr.bf16.mxu1 %v1345_v15  ;;  %v1389_v4 = vpack.c.bf16 %v1054_v2, %v1053_v0  ;;  %v1037_v5 = vld [vmem:[%s2312_s5 + $0x150] sm:$0xff]  ;;  %v1361_v13 = vpack.c.bf16 %v364_v11, %v363_v7  ;;  %v1056_v15 = vld [vmem:[%s2312_s5 + $0x1e8] sm:$0xff]  ;;  %v1039_v16 = vld [vmem:[%s2312_s5 + $0x160] sm:$0xff] }
  0x30   :  { %v1391_v1 = vpack.c.bf16 %v1038_v6, %v1037_v5  ;;  %v1040_v19 = vld [vmem:[%s2312_s5 + $0x168] sm:$0xff]  ;;  %v365_v20 = vld [vmem:[%s2312_s5 + $0xf0] sm:$0xff]  ;;  %v366_v21 = vld [vmem:[%s2312_s5 + $0xf8] sm:$0xff] }
  0x31   :  { %1376 = vmatpush3.bf16.msra.mxu0 %v1375_v14  ;;  %v1055_v14 = vld [vmem:[%s2312_s5 + $0x1e0] sm:$0xff]  ;;  %v1042_v30 = vld [vmem:[%s2312_s5 + $0x178] sm:$0xff]  ;;  %v1077_v34 = vld [vmem:[%s2312_s5 + $0x288] sm:$0xff] }
  0x32   :  { %1378 = vmatprep.subr.bf16.mxu0 %v1377_v25  ;;  %1348 = vmatpush3.bf16.msra.mxu1 %v1347_v22  ;;  %v1393_v18 = vpack.c.bf16 %v1056_v15, %v1055_v14  ;;  %v1365_v22 = vpack.c.bf16 %v366_v21, %v365_v20  ;;  %v349_v25 = vld [vmem:[%s2312_s5 + $0x70] sm:$0xff]  ;;  %v1076_v33 = vld [vmem:[%s2312_s5 + $0x280] sm:$0xff]  ;;  %v1061_v54 = vld [vmem:[%s2312_s5 + $0x208] sm:$0xff] }
  0x33   :  { %1350 = vmatprep.subr.bf16.mxu1 %v1349_v32  ;;  %v1062_v61 = vld [vmem:[%s2312_s5 + $0x210] sm:$0xff]  ;;  %v1080_v63 = vld [vmem:[%s2312_s5 + $0x2a0] sm:$0xff]  ;;  %v1081_v0 = vld [vmem:[%s2312_s5 + $0x2a8] sm:$0xff] }
  0x34   :  { %v1065_v5 = vld [vmem:[%s2312_s5 + $0x228] sm:$0xff]  ;;  %v1082_v6 = vld [vmem:[%s2312_s5 + $0x2b0] sm:$0xff]  ;;  %v1083_v7 = vld [vmem:[%s2312_s5 + $0x2b8] sm:$0xff] }
  0x35   :  { %1380 = vmatpush3.bf16.msra.mxu0 %v1379_v39  ;;  %v350_v39 = vld [vmem:[%s2312_s5 + $0x78] sm:$0xff]  ;;  %v1413_v11 = vpack.c.bf16 %v1083_v7, %v1082_v6  ;;  %v1066_v12 = vld [vmem:[%s2312_s5 + $0x230] sm:$0xff]  ;;  %v1085_v14 = vld [vmem:[%s2312_s5 + $0x2c8] sm:$0xff] }
  0x36   :  { %1352 = vmatpush3.bf16.msra.mxu1 %v1351_v52  ;;  %v1367_v31 = vpack.c.bf16 %v350_v39, %v349_v25  ;;  %v1067_v9 = vld [vmem:[%s2312_s5 + $0x238] sm:$0xff]  ;;  %v1070_v25 = vld [vmem:[%s2312_s5 + $0x250] sm:$0xff] }
  0x37   :  { %v1415_v15 = vpack.c.bf16 %v1067_v9, %v1066_v12  ;;  %v1087_v20 = vld [vmem:[%s2312_s5 + $0x2d8] sm:$0xff] }
  0x38   :  { %v1071_v39 = vld [vmem:[%s2312_s5 + $0x258] sm:$0xff] }
  0xff   :  { %v284_v44 = vpop.f32.mrb[0].mxu0 }
 0x100   :  { %v285_v45 = vadd.f32 %v284_v44, %v188_v42  ;;  %v286_v46 = vpop.f32.mrb[1].mxu0  ;;  %v1034_v42 = vld [vmem:[%s2312_s5 + $0x138] sm:$0xff] }
 0x101   :  { %v287_v47 = vadd.f32 %v286_v46, %v192_v43  ;;  %v1381_v43 = vpack.c.bf16 %v1050_v53, %v1049_v35  ;;  %v1383_v44 = vpack.c.bf16 %v1034_v42, %v1033_v38  ;;  %v360_v46 = vld [vmem:[%s2312_s5 + $0xc8] sm:$0xff]  ;;  %v1401_v35 = vpack.c.bf16 %v1077_v34, %v1076_v33  ;;  %v289_v42 = vld [vmem:[%s2310_s3] sm:$0x3] }
 0x103   :  { %v291_v48 = vadd.f32 %v287_v47, %v285_v45  ;;  %1382 = vmatprep.subr.bf16.mxu0 %v1381_v43  ;;  %v290_v43 = vld [vmem:[%s2311_s4] sm:$0x3] }
 0x104   :  { %1384 = vmatpush3.bf16.msra.mxu0 %v1383_v44  ;;  %v316_v44 = vrot.slane %v289_v42, %v1855_v41  ;;  %v325_v50 = vrot.slane %v290_v43, %v1849_v37 }
 0x105   :  { %292 = vadd.xlane.f32.xlu0 %v291_v48  ;;  %v343_v48 = vld [vmem:[%s2312_s5 + $0x40] sm:$0xff]  ;;  %1386 = vmatprep.subr.bf16.mxu0 %v1385_v57 }
 0x106   :  { %v1355_v51 = vpack.c.bf16 %v344_v49, %v343_v48  ;;  %v329_v48 = vrot.slane %v290_v43, %v1855_v41 }
 0x108   :  { %1388 = vmatpush3.bf16.msra.mxu0 %v1387_v58 }
 0x109   :  { %1390 = vmatprep.subr.bf16.mxu0 %v1389_v4  ;;  %v1064_v4 = vld [vmem:[%s2312_s5 + $0x220] sm:$0xff] }
 0x10c   :  { %1392 = vmatpush3.bf16.msra.mxu0 %v1391_v1  ;;  %v1411_v1 = vpack.c.bf16 %v1065_v5, %v1064_v4 }
 0x10d   :  { %1394 = vmatprep.subr.bf16.mxu0 %v1393_v18  ;;  %v1069_v18 = vld [vmem:[%s2312_s5 + $0x248] sm:$0xff] }
 0x192   :  { %v293_v40 = vpop.xlane.xlu0 %292 }
 0x193   :  { %v295_v10 = vmul.f32 0.00390625, %v293_v40  ;;  %v1057_v40 = vld [vmem:[%s2312_s5 + $0x1f0] sm:$0xff] }
 0x195   :  { %v1931_v23 = vsub.f32 %v285_v45, %v295_v10  ;;  %v1933_v26 = vsub.f32 %v287_v47, %v295_v10  ;;  %v359_v45 = vld [vmem:[%s2312_s5 + $0xc0] sm:$0xff]  ;;  %v1395_v10 = vpack.c.bf16 %v1040_v19, %v1039_v16  ;;  %v1086_v19 = vld [vmem:[%s2312_s5 + $0x2d0] sm:$0xff] }
 0x196   :  { %v1353_v47 = vpack.c.bf16 %v360_v46, %v359_v45  ;;  %v312_v45 = vrot.slane %v289_v42, %v1849_v37  ;;  %v678_v42 = vld [vmem:[%s2314_s7 + $0x8] sm:$0xff] }
 0x197   :  { %v298_v27 = vmul.f32 %v1931_v23, %v1931_v23  ;;  %v299_v28 = vmul.f32 %v1933_v26, %v1933_v26  ;;  %1396 = vmatpush3.bf16.msra.mxu0 %v1395_v10  ;;  %v1089_v10 = vld [vmem:[%s2312_s5 + $0x2e8] sm:$0xff] }
 0x198   :  { %1354 = vmatprep.subr.bf16.mxu1 %v1353_v47 }
 0x199   :  { %v300_v29 = vadd.f32 %v299_v28, %v298_v27  ;;  %1356 = vmatpush3.bf16.msra.mxu1 %v1355_v51  ;;  %v1058_v27 = vld [vmem:[%s2312_s5 + $0x1f8] sm:$0xff]  ;;  %v1060_v51 = vld [vmem:[%s2312_s5 + $0x200] sm:$0xff] }
 0x19a   :  { %1358 = vmatprep.subr.bf16.mxu1 %v1357_v62  ;;  %v1397_v28 = vpack.c.bf16 %v1058_v27, %v1057_v40  ;;  %v1403_v59 = vpack.c.bf16 %v1061_v54, %v1060_v51  ;;  %v1063_v62 = vld [vmem:[%s2312_s5 + $0x218] sm:$0xff]  ;;  %v1088_v40 = vld [vmem:[%s2312_s5 + $0x2e0] sm:$0xff]  ;;  %v1423_v27 = vpack.c.bf16 %v1071_v39, %v1070_v25  ;;  %v1096_v51 = vld [vmem:[%s2314_s7 + $0x50] sm:$0xff] }
 0x19b   :  { %301 = vadd.xlane.f32.xlu0 %v300_v29  ;;  %v1041_v29 = vld [vmem:[%s2312_s5 + $0x170] sm:$0xff]  ;;  %v1407_v2 = vpack.c.bf16 %v1063_v62, %v1062_v61  ;;  %v1097_v54 = vld [vmem:[%s2314_s7 + $0x58] sm:$0xff] }
 0x19c   :  { %v1399_v32 = vpack.c.bf16 %v1042_v30, %v1041_v29  ;;  %1398 = vmatprep.subr.bf16.mxu0 %v1397_v28  ;;  %v1425_v28 = vpack.c.bf16 %v1089_v10, %v1088_v40  ;;  %v1072_v29 = vld [vmem:[%s2312_s5 + $0x260] sm:$0xff]  ;;  %v1073_v30 = vld [vmem:[%s2312_s5 + $0x268] sm:$0xff]  ;;  %v684_v61 = vld [vmem:[%s2314_s7 + $0x38] sm:$0xff] }
 0x19d   :  { %1360 = vmatpush3.bf16.msra.mxu1 %v1359_v3  ;;  %v1409_v3 = vpack.c.bf16 %v1081_v0, %v1080_v63  ;;  %v1427_v33 = vpack.c.bf16 %v1073_v30, %v1072_v29  ;;  %v1100_v62 = vld [vmem:[%s2314_s7 + $0x70] sm:$0xff]  ;;  %v1101_v63 = vld [vmem:[%s2314_s7 + $0x78] sm:$0xff] }
 0x19e   :  { %1362 = vmatprep.subr.bf16.mxu1 %v1361_v13  ;;  %1400 = vmatpush3.bf16.msra.mxu0 %v1399_v32  ;;  %v1084_v13 = vld [vmem:[%s2312_s5 + $0x2c0] sm:$0xff]  ;;  %v1091_v32 = vld [vmem:[%s2312_s5 + $0x2f8] sm:$0xff] }
 0x19f   :  { %v1417_v16 = vpack.c.bf16 %v1085_v14, %v1084_v13 }
 0x1a1   :  { %1364 = vmatpush3.bf16.msra.mxu1 %v1363_v17  ;;  %v1068_v17 = vld [vmem:[%s2312_s5 + $0x240] sm:$0xff] }
 0x1a2   :  { %1366 = vmatprep.subr.bf16.mxu1 %v1365_v22  ;;  %v1419_v21 = vpack.c.bf16 %v1069_v18, %v1068_v17  ;;  %v1421_v22 = vpack.c.bf16 %v1087_v20, %v1086_v19  ;;  %v595_v19 = vsub.s32 2, %v1846_v36  ;;  %v669_v20 = vsub.s32 3, %v1846_v36 }
 0x1a5   :  { %1368 = vmatpush3.bf16.msra.mxu1 %v1367_v31  ;;  %v1090_v31 = vld [vmem:[%s2312_s5 + $0x2f0] sm:$0xff] }
 0x1a6   :  { %1402 = vmatprep.subr.bf16.mxu1 %v1401_v35  ;;  %v1429_v34 = vpack.c.bf16 %v1091_v32, %v1090_v31  ;;  %v1074_v35 = vld [vmem:[%s2312_s5 + $0x270] sm:$0xff] }
 0x228   :  { %v302_v52 = vpop.xlane.xlu0 %301 }
 0x229   :  { %v303_v53 = vmul.f32 0.00390625, %v302_v52  ;;  %v1075_v52 = vld [vmem:[%s2312_s5 + $0x278] sm:$0xff] }
 0x22b   :  { %v304_v38 = vadd.f32 1e-05, %v303_v53  ;;  %v1431_v53 = vpack.c.bf16 %v1075_v52, %v1074_v35 }
 0x22d   :  { %1476 = vrsqrt.f32 %v304_v38  ;;  %v677_v38 = vld [vmem:[%s2314_s7] sm:$0xff] }
 0x22e   :  { %v1434_v43 = vpack.c.bf16 %v678_v42, %v677_v38  ;;  %v1106_v42 = vld [vmem:[%s2314_s7 + $0x90] sm:$0xff] }
 0x237   :  { %v1477_v46 = vpop.eup %1476 }
 0x238   :  { %v307_v47 = vmul.f32 %v1477_v46, %v1933_v26  ;;  %v306_v49 = vmul.f32 %v1477_v46, %v1931_v23  ;;  %v1078_v26 = vld [vmem:[%s2312_s5 + $0x290] sm:$0xff]  ;;  %v1079_v23 = vld [vmem:[%s2312_s5 + $0x298] sm:$0xff]  ;;  %v1525_v46 = vmov 0.0|0.0  }
 0x239   :  { %v1405_v60 = vpack.c.bf16 %v1079_v23, %v1078_v26  ;;  %1433 = vmatprep.subr.bf16.mxu0 %v1525_v46  ;;  %v682_v26 = vld [vmem:[%s2314_s7 + $0x28] sm:$0xff]  ;;  %v1098_v23 = vld [vmem:[%s2314_s7 + $0x60] sm:$0xff] }
 0x23a   :  { %v320_v55 = vmul.f32 %v316_v44, %v307_v47  ;;  %v319_v56 = vmul.f32 %v312_v45, %v306_v49  ;;  %v1094_v44 = vld [vmem:[%s2314_s7 + $0x40] sm:$0xff]  ;;  %v1095_v45 = vld [vmem:[%s2314_s7 + $0x48] sm:$0xff]  ;;  %v680_v49 = vld [vmem:[%s2314_s7 + $0x18] sm:$0xff] }
 0x23b   :  { %v1446_v47 = vpack.c.bf16 %v1095_v45, %v1094_v44  ;;  %v1108_v45 = vld [vmem:[%s2314_s7 + $0xa0] sm:$0xff] }
 0x23c   :  { %v333_v57 = vadd.f32 %v329_v48, %v320_v55  ;;  %v332_v58 = vadd.f32 %v325_v50, %v319_v56  ;;  %v679_v48 = vld [vmem:[%s2314_s7 + $0x10] sm:$0xff]  ;;  %v1449_v55 = vpack.c.bf16 %v1097_v54, %v1096_v51  ;;  %v681_v56 = vld [vmem:[%s2314_s7 + $0x20] sm:$0xff] }
 0x23d   :  { %v1437_v50 = vpack.c.bf16 %v680_v49, %v679_v48  ;;  %v1110_v49 = vld [vmem:[%s2314_s7 + $0xb0] sm:$0xff]  ;;  %v676_v51 = vld [vmem:[%s2315_s8] sm:$0xf] }
 0x23e   :  { %435 = vmatprep.mubr.f32.mxu1 %v333_v57  ;;  %548 = vmatprep.mubr.f32.mxu0 %v333_v57  ;;  %v688_v54 = vrot.slane %v676_v51, %v1849_v37 }
 0x23f   :  { %436 = vmatmul.mubr.f32.vlgmr.msra.gmra.mrb[0].mxu1 %v332_v58  ;;  %549 = vmatmul.mubr.f32.vlgmr.msra.gmra.mrb[2].mxu0 %v332_v58 }
 0x240   :  { %1404 = vmatpush3.bf16.msra.mxu1 %v1403_v59  ;;  %661 = vmatprep.mubr.f32.mxu1 %v333_v57  ;;  %v1440_v57 = vpack.c.bf16 %v682_v26, %v681_v56  ;;  %v781_v56 = vrot.slane %v676_v51, %v1855_v41 }
 0x241   :  { %1406 = vmatprep.subr.bf16.mxu1 %v1405_v60  ;;  %1435 = vmatpush3.bf16.msra.mxu0 %v1434_v43  ;;  %v683_v60 = vld [vmem:[%s2314_s7 + $0x30] sm:$0xff]  ;;  %v1107_v43 = vld [vmem:[%s2314_s7 + $0x98] sm:$0xff] }
 0x242   :  { %1436 = vmatprep.subr.bf16.mxu0 %v1525_v46  ;;  %1264 = vmatprep.mubr.msk.f32.mxu0 %vm1526_vm7, %v1524_v8  ;;  %v1443_v0 = vpack.c.bf16 %v684_v61, %v683_v60  ;;  %v1461_v44 = vpack.c.bf16 %v1107_v43, %v1106_v42 }
 0x244   :  { %1408 = vmatpush3.bf16.msra.mxu1 %v1407_v2  ;;  %v1455_v2 = vpack.c.bf16 %v1101_v63, %v1100_v62 }
 0x245   :  { %1410 = vmatprep.subr.bf16.mxu1 %v1409_v3  ;;  %1438 = vmatpush3.bf16.msra.mxu0 %v1437_v50  ;;  %v334_v3 = vld [vmem:[%s2313_s6] sm:$0xf] }
 0x246   :  { %1439 = vmatprep.subr.bf16.mxu0 %v1525_v46  ;;  %v370_v6 = vrot.slane %v334_v3, %v1849_v37  ;;  %v483_v14 = vrot.slane %v334_v3, %v1855_v41  ;;  %v596_v39 = vrot.slane %v334_v3, %v595_v19  ;;  %v670_v40 = vrot.slane %v334_v3, %v669_v20 }
 0x247   :  { %v944_v41 = vrot.slane %v676_v51, %v669_v20  ;;  %v991_v20 = vld [vmem:[#allocation2] sm:$0x1] }
 0x248   :  { %1412 = vmatpush3.bf16.msra.mxu1 %v1411_v1 }
 0x249   :  { %1414 = vmatprep.subr.bf16.mxu1 %v1413_v11  ;;  %1441 = vmatpush3.bf16.msra.mxu0 %v1440_v57 }
 0x24a   :  { %1442 = vmatprep.subr.bf16.mxu0 %v1525_v46 }
 0x24c   :  { %1416 = vmatpush3.bf16.msra.mxu1 %v1415_v15 }
 0x24d   :  { %1418 = vmatprep.subr.bf16.mxu1 %v1417_v16  ;;  %1444 = vmatpush3.bf16.msra.mxu0 %v1443_v0 }
 0x24e   :  { %1457 = vmatprep.subr.bf16.mxu0 %v1525_v46 }
 0x250   :  { %1420 = vmatpush3.bf16.msra.mxu1 %v1419_v21 }
 0x251   :  { %1422 = vmatprep.subr.bf16.mxu1 %v1421_v22 }
 0x254   :  { %1424 = vmatpush3.bf16.msra.mxu1 %v1423_v27 }
 0x255   :  { %1426 = vmatprep.subr.bf16.mxu1 %v1425_v28 }
 0x258   :  { %1428 = vmatpush3.bf16.msra.mxu1 %v1427_v33  ;;  %v1104_v33 = vld [vmem:[%s2314_s7 + $0x80] sm:$0xff] }
 0x259   :  { %1430 = vmatprep.subr.bf16.mxu1 %v1429_v34  ;;  %v1105_v34 = vld [vmem:[%s2314_s7 + $0x88] sm:$0xff] }
 0x25c   :  { %1432 = vmatpush3.bf16.msra.mxu1 %v1431_v53  ;;  %v1458_v53 = vpack.c.bf16 %v1105_v34, %v1104_v33 }
 0x25d   :  { %1445 = vmatprep.subr.bf16.mxu1 %v1525_v46 }
 0x25f   :  { %662 = vmatmul.mubr.f32.vlgmr.msra.gmra.mrb[2].mxu1 %v332_v58  ;;  %v1099_v58 = vld [vmem:[%s2314_s7 + $0x68] sm:$0xff] }
 0x260   :  { %1447 = vmatpush3.bf16.msra.mxu1 %v1446_v47  ;;  %v1452_v59 = vpack.c.bf16 %v1099_v58, %v1098_v23  ;;  %1283 = vmatprep.mubr.msk.f32.mxu1 %vm1526_vm7, %v1524_v8  ;;  %v1109_v47 = vld [vmem:[%s2314_s7 + $0xa8] sm:$0xff] }
 0x261   :  { %1448 = vmatprep.subr.bf16.mxu1 %v1525_v46  ;;  %v1464_v48 = vpack.c.bf16 %v1109_v47, %v1108_v45 }
 0x264   :  { %1450 = vmatpush3.bf16.msra.mxu1 %v1449_v55 }
 0x265   :  { %1451 = vmatprep.subr.bf16.mxu1 %v1525_v46 }
 0x268   :  { %1453 = vmatpush3.bf16.msra.mxu1 %v1452_v59 }
 0x269   :  { %1454 = vmatprep.subr.bf16.mxu1 %v1525_v46 }
 0x26c   :  { %1456 = vmatpush3.bf16.msra.mxu1 %v1455_v2 }
 0x312   :  { %v1148_v4 = vpop.f32.mrb[0].mxu1  ;;  %v1183_v5 = vpop.f32.mrb[2].mxu0 }
 0x313   :  { %v1149_v7 = vpop.f32.mrb[1].mxu1  ;;  %v1184_v1 = vpop.f32.mrb[3].mxu0 }
 0x314   :  { %v1150_v11 = vadd.f32 %v1149_v7, %v1148_v4  ;;  %v1185_v12 = vadd.f32 %v1184_v1, %v1183_v5  ;;  %v870_v4 = vrot.slane %v676_v51, %v595_v19 }
 0x316   :  { %v438_v9 = vadd.f32 %v1150_v11, %v370_v6  ;;  %v551_v15 = vadd.f32 %v1185_v12, %v483_v14 }
 0x318   :  { %v1026_v13 = vmul.f32 -1.442695, %v438_v9  ;;  %v1059_v16 = vmul.f32 -1.442695, %v551_v15 }
 0x31a   :  { %1478 = vpow2.f32 %v1026_v13 }
 0x31b   :  { %1480 = vpow2.f32 %v1059_v16 }
 0x324   :  { %v1479_v17 = vpop.eup %1478 }
 0x325   :  { %v444_v18 = vadd.f32 1.0, %v1479_v17  ;;  %v1481_v21 = vpop.eup %1480 }
 0x326   :  { %v557_v22 = vadd.f32 1.0, %v1481_v21  ;;  %v1527_v21 = vmov 0  }
 0x327   :  { %1482 = vrcp.f32 %v444_v18  ;;  %1474 = vset.pattern.permute.xlu1 %v1527_v21  ;;  %1475 = vset.pattern.permute.xlu0 %v1527_v21 }
 0x328   :  { %1484 = vrcp.f32 %v557_v22 }
 0x331   :  { %v1483_v10 = vpop.eup %1482 }
 0x332   :  { %v1218_v25 = vpop.f32.mrb[2].mxu1  ;;  %v671_v30 = vmul.f32 %v1483_v10, %v670_v40  ;;  %v1485_v32 = vpop.eup %1484  ;;  %v1113_v10 = vld [vmem:[%s2316_s9] ss:$0 sm:$0xff]  ;;  %s1528_s9 = smov [#allocation3]  }
 0x333   :  { %v1219_v27 = vpop.f32.mrb[3].mxu1  ;;  %v674_v35 = vsub.f32 1.0, %v1485_v32 }
 0x334   :  { %v1220_v28 = vadd.f32 %v1219_v27, %v1218_v25 }
 0x336   :  { %v664_v29 = vadd.f32 %v1220_v28, %v596_v39  ;;  %v1114_v28 = vld [vmem:[%s2317_s10] ss:$0 sm:$0xff]  ;;  %s1018_s10 = sshll.u32 %s1528_s9, 4  ;;  %s1019_s10 = int_to_ptr.vmem [resolvable:$true] %s1018_s10 }
 0x337   :  { %s1504_s5 = scalar_lea.vmem %s1019_s10, 32  ;;  %p1505_p1 = scmp.lt.s32.totalorder %s1019_s10, %s1019_s10 }
 0x338   :  { %v672_v31 = vadd.f32 %v671_v30, %v664_v29  ;;  %v1115_v30 = vld [vmem:[%s2318_s11] ss:$0 sm:$0xff]  ;;  %s1500_s11 = scalar_lea.vmem %s1019_s10, 16 }
 0x339   :  { %p1501_p0 = scmp.ne.s32.totalorder %s1019_s10, %s1500_s11  ;;  %p1506_p2 = scmp.lt.s32.totalorder %s1504_s5, %s1500_s11 }
 0x33a   :  { %1486 = vtanh.f32 %v672_v31 }
 0x33b   :  { %p1507_p3 = por %p1506_p2, %p1505_p1 }
 0x33d   :  { %p1508_p4 = pnand %p1507_p3, %p1501_p0 }
 0x344   :  { %v1487_v52 = vpop.eup %1486 }
 0x345   :  { %v675_v38 = vmul.f32 %v1487_v52, %v674_v35  ;;  %v1004_v35 = vand.u32 127, %v185_v24 }
 0x347   :  { %1265 = vmatmul.mubr.msk.f32.vlgmr.msra.gmra.mrb[4].mxu0 %vm689_vm8, %v675_v38  ;;  %1284 = vmatmul.mubr.msk.f32.vlgmr.msra.gmra.mrb[4].mxu1 %vm689_vm8, %v675_v38 }
 0x348   :  { %1459 = vmatpush3.bf16.msra.mxu0 %v1458_v53  ;;  %1302 = vmatprep.mubr.msk.f32.mxu0 %vm1526_vm7, %v1524_v8  ;;  %v1111_v8 = vld [vmem:[%s2314_s7 + $0xb8] sm:$0xff]  ;;  %v1007_v53 = vsub.s32 %v1004_v35, %v1846_v36 }
 0x349   :  { %1460 = vmatprep.subr.bf16.mxu0 %v1525_v46  ;;  %v1467_v50 = vpack.c.bf16 %v1111_v8, %v1110_v49 }
 0x34c   :  { %1462 = vmatpush3.bf16.msra.mxu0 %v1461_v44 }
 0x34d   :  { %1463 = vmatprep.subr.bf16.mxu0 %v1525_v46 }
 0x350   :  { %1465 = vmatpush3.bf16.msra.mxu0 %v1464_v48 }
 0x351   :  { %1466 = vmatprep.subr.bf16.mxu0 %v1525_v46 }
 0x354   :  { %1468 = vmatpush3.bf16.msra.mxu0 %v1467_v50 }
 0x357   :  { %1303 = vmatmul.mubr.msk.f32.vlgmr.msra.gmra.mrb[6].mxu0 %vm689_vm8, %v675_v38 }
 0x41a   :  { %v759_v55 = vpop.f32.mrb[4].mxu0  ;;  %v848_v26 = vpop.f32.mrb[4].mxu1 }
 0x41b   :  { %v760_v23 = vadd.f32 %v759_v55, %v688_v54  ;;  %v1266_v57 = vpop.f32.mrb[5].mxu0  ;;  %v1285_v58 = vpop.f32.mrb[5].mxu1  ;;  %v849_v60 = vadd.f32 %v848_v26, %v781_v56 }
 0x41d   :  { %v1093_v59 = vmul.f32 -1.442695, %v760_v23  ;;  %v1103_v46 = vmul.f32 -1.442695, %v849_v60 }
 0x41f   :  { %1488 = vpow2.f32 %v1093_v59 }
 0x420   :  { %1490 = vpow2.f32 %v1103_v46 }
 0x429   :  { %v1489_v61 = vpop.eup %1488 }
 0x42a   :  { %v766_v62 = vadd.f32 1.0, %v1489_v61  ;;  %v937_v63 = vpop.f32.mrb[6].mxu0  ;;  %v1491_v2 = vpop.eup %1490 }
 0x42b   :  { %v1304_v0 = vpop.f32.mrb[7].mxu0  ;;  %v855_v3 = vadd.f32 1.0, %v1491_v2  ;;  %v938_v6 = vadd.f32 %v937_v63, %v870_v4 }
 0x42c   :  { %1492 = vrcp.f32 %v766_v62 }
 0x42d   :  { %1494 = vrcp.f32 %v855_v3 }
 0x436   :  { %v1493_v5 = vpop.eup %1492 }
 0x437   :  { %v945_v7 = vmul.f32 %v1493_v5, %v944_v41  ;;  %v1495_v11 = vpop.eup %1494 }
 0x438   :  { %v948_v12 = vsub.f32 1.0, %v1495_v11 }
 0x439   :  { %v946_v1 = vadd.f32 %v945_v7, %v938_v6 }
 0x43b   :  { %1496 = vtanh.f32 %v946_v1 }
 0x445   :  { %v1497_v9 = vpop.eup %1496 }
 0x446   :  { %v949_v13 = vmul.f32 %v1497_v9, %v948_v12 }
 0x448   :  { %v952_v14 = vsel %vm689_vm8, %v949_v13, 0.0 }
 0x449   :  { %953 = vadd.xlane.f32.xlu1 %v952_v14 }
 0x4d6   :  { %v954_v15 = vpop.xlane.xlu1 %953 }
 0x4d7   :  { %v956_v16 = vmul.f32 0.015625, %v954_v15 }
 0x4d9   :  { %v957_v17 = vsub.f32 %v949_v13, %v956_v16 }
 0x4db   :  { %v958_v18 = vmul.f32 %v957_v17, %v957_v17 }
 0x4dd   :  { %v959_v19 = vsel %vm689_vm8, %v958_v18, 0.0 }
 0x4de   :  { %960 = vadd.xlane.f32.xlu1 %v959_v19 }
 0x4ef   :  { %994 = vperm.xlu1 %1474, %v991_v20  }
 0x56b   :  { %v961_v22 = vpop.xlane.xlu1 %960 }
 0x56c   :  { %v962_v25 = vmul.f32 0.015625, %v961_v22 }
 0x56e   :  { %v963_v39 = vadd.f32 1e-05, %v962_v25 }
 0x56f   :  { %v995_v34 = vpop.permute.xlu1 %994 }
 0x570   :  { %1498 = vrsqrt.f32 %v963_v39  ;;  %v1000_v52 = vrot.slane %v995_v34, %v1849_v37 }
 0x57a   :  { %v1499_v40 = vpop.eup %1498 }
 0x57b   :  { %v965_v27 = vmul.f32 %v1499_v40, %v957_v17 }
 0x57d   :  { %v972_v29 = vmul.f32 %v1113_v10, %v965_v27 }
 0x57f   :  { %v979_v31 = vadd.f32 %v1114_v28, %v972_v29 }
 0x581   :  { %v987_v32 = vmul.f32 %v1115_v30, %v979_v31 }
 0x583   :  { %v988_v33 = vsel %vm689_vm8, %v987_v32, 0.0 }
 0x584   :  { %989 = vadd.xlane.f32.xlu0 %v988_v33 }
 0x611   :  { %v990_v38 = vpop.xlane.xlu0 %989 }
 0x612   :  { %v1001_v42 = vadd.f32 %v1000_v52, %v990_v38 }
 0x614   :  { %v1008_v43 = vrot.slane %v1001_v42, %v1007_v53 }
 0x616   :  { %1011 = vst.msk [vmem:[#allocation3] sm:$0x1] %vm1010_vm9, %v1008_v43 }
 0x617   :  { %1511 = shalt.err (!%p1508_p4)
}
 0x618   :  { %s1512_s6 = scalar_lea.hbm %s2320_s13, 16 }
 0x619   :  { %p1513_p5 = scmp.ne.s32.totalorder %s2320_s13, %s1512_s6  ;;  %p1516_p6 = scmp.lt.u32.totalorder %s1512_s6, %s2320_s13 }
 0x61b   :  { %p1518_p7 = pnand %p1516_p6, %p1513_p5 }
 0x61d   :  { %1521 = shalt.err (!%p1518_p7)
}
 0x61e   :  { %1021 = dma.vmem_to_hbm [thread:$0]  %s1019_s10, 16, %s2320_s13, [#allocation4]  }
 0x61f   :  { %1522 = dma.done.wait [#allocation4], 16  }
 0x620   :  { %1523 = vsyncadd [#allocation4], 4294967280 }
 0x621   :  { %1025 = vsyncpa [#allocation4], 1 }

// kernel: tpu_custom_call.1
= control target key start
LH: loop header
LB: loop body
LE: loop exit
PB: predicated region body
PF: predicated region fallthrough
CT: control target
= control target key end

     0   :  { %s2307_s0 = inlined_call_operand.vmem [shape: f32[8,32,128], index: 0, kind: input, shape index: {}]   ;;  %s2308_s1 = inlined_call_operand.vmem [shape: f32[128,256], index: 1, kind: input, shape index: {}]   ;;  %s2309_s2 = inlined_call_operand.vmem [shape: f32[1,256], index: 2, kind: input, shape index: {}]   ;;  %s2310_s3 = inlined_call_operand.vmem [shape: f32[1,256], index: 3, kind: input, shape index: {}]   ;;  %s2311_s4 = inlined_call_operand.vmem [shape: f32[1,256], index: 4, kind: input, shape index: {}]   ;;  %s2312_s5 = inlined_call_operand.vmem [shape: f32[3,256,64], index: 5, kind: input, shape index: {}]   ;;  %s2313_s6 = inlined_call_operand.vmem [shape: f32[4,64], index: 6, kind: input, shape index: {}]   ;;  %s2314_s7 = inlined_call_operand.vmem [shape: f32[3,64,64], index: 7, kind: input, shape index: {}]   ;;  %s2315_s8 = inlined_call_operand.vmem [shape: f32[4,64], index: 8, kind: input, shape index: {}]   ;;  %s2316_s9 = inlined_call_operand.vmem [shape: f32[1,64], index: 9, kind: input, shape index: {}]   ;;  %s2317_s10 = inlined_call_operand.vmem [shape: f32[1,64], index: 10, kind: input, shape index: {}]   ;;  %s2318_s11 = inlined_call_operand.vmem [shape: f32[1,64], index: 11, kind: input, shape index: {}]   ;;  %s2319_s12 = inlined_call_operand.<no memory space> [shape: f32[1,1], index: 12, kind: input, shape index: {}]   ;;  %s2320_s13 = inlined_call_operand.hbm [shape: f32[1,8], index: 13, kind: output, shape index: {}]  }
   0x1   :  { %v18_v0 = vstv %s2319_s12 }
   0x2   :  { %19 = vst [vmem:[#allocation2] sm:$0x1] %v18_v0 }
   0x3   :  { %v152_v1 = vld [vmem:[%s2308_s1 + $0x8] sm:$0xff]  ;;  %v154_v2 = vld [vmem:[%s2308_s1 + $0x18] sm:$0xff]  ;;  %v151_v3 = vld [vmem:[%s2308_s1] sm:$0xff]  ;;  %v1524_v8 = vmov 0.0   ;;  %vm203_vm0 = vcmask 1041409   ;;  %vm205_vm1 = vcmask 1042434  }
   0x4   :  { %v1305_v4 = vpack.c.bf16 %v154_v2, %v152_v1  ;;  %v153_v5 = vld [vmem:[%s2308_s1 + $0x10] sm:$0xff]  ;;  %v156_v6 = vld [vmem:[%s2308_s1 + $0x28] sm:$0xff]  ;;  %v158_v7 = vld [vmem:[%s2308_s1 + $0x38] sm:$0xff]  ;;  %282 = vmatprep.mubr.f32.mxu0 %v1524_v8 }
   0x5   :  { %v1307_v9 = vpack.c.bf16 %v153_v5, %v151_v3  ;;  %v1309_v10 = vpack.c.bf16 %v158_v7, %v156_v6  ;;  %v155_v11 = vld [vmem:[%s2308_s1 + $0x20] sm:$0xff]  ;;  %v157_v12 = vld [vmem:[%s2308_s1 + $0x30] sm:$0xff]  ;;  %v160_v13 = vld [vmem:[%s2308_s1 + $0x48] sm:$0xff] }
   0x6   :  { %1306 = vmatprep.subr.bf16.mxu0 %v1305_v4  ;;  %v162_v14 = vld [vmem:[%s2308_s1 + $0x58] sm:$0xff]  ;;  %v1311_v15 = vpack.c.bf16 %v157_v12, %v155_v11  ;;  %v159_v17 = vld [vmem:[%s2308_s1 + $0x40] sm:$0xff]  ;;  %v161_v18 = vld [vmem:[%s2308_s1 + $0x50] sm:$0xff] }
   0x7   :  { %1308 = vmatpush1.bf16.msra.mxu0 %v1307_v9  ;;  %v1313_v16 = vpack.c.bf16 %v162_v14, %v160_v13  ;;  %v164_v19 = vld [vmem:[%s2308_s1 + $0x68] sm:$0xff]  ;;  %v166_v20 = vld [vmem:[%s2308_s1 + $0x78] sm:$0xff]  ;;  %v1315_v21 = vpack.c.bf16 %v161_v18, %v159_v17  ;;  %v163_v22 = vld [vmem:[%s2308_s1 + $0x60] sm:$0xff] }
   0x8   :  { %1310 = vmatprep.subr.bf16.mxu0 %v1309_v10  ;;  %v1317_v23 = vpack.c.bf16 %v166_v20, %v164_v19  ;;  %v165_v24 = vld [vmem:[%s2308_s1 + $0x70] sm:$0xff]  ;;  %v168_v25 = vld [vmem:[%s2308_s1 + $0x88] sm:$0xff]  ;;  %v170_v26 = vld [vmem:[%s2308_s1 + $0x98] sm:$0xff] }
   0x9   :  { %v1660_v27 = vld [vmem:[%s2308_s1 + $0x80] sm:$0xff]  ;;  %v1665_v28 = vld [vmem:[%s2308_s1 + $0x90] sm:$0xff]  ;;  %v1670_v29 = vld [vmem:[%s2308_s1 + $0xa8] sm:$0xff]  ;;  %v1319_v36 = vpack.c.bf16 %v165_v24, %v163_v22  ;;  %v1321_v45 = vpack.c.bf16 %v170_v26, %v168_v25 }
   0xa   :  { %v1675_v30 = vld [vmem:[%s2308_s1 + $0xb8] sm:$0xff]  ;;  %v47_v31 = vld [vmem:[%s2307_s0] sm:$0xff]  ;;  %v1688_v33 = vld [vmem:[%s2308_s1 + $0xb0] sm:$0xff]  ;;  %v1323_v59 = vpack.c.bf16 %v1665_v28, %v1660_v27 }
   0xb   :  { %1312 = vmatpush1.bf16.msra.mxu0 %v1311_v15  ;;  %v1683_v32 = vld [vmem:[%s2308_s1 + $0xa0] sm:$0xff]  ;;  %v48_v34 = vld [vmem:[%s2307_s0 + $0x8] sm:$0xff]  ;;  %v49_v35 = vld [vmem:[%s2307_s0 + $0x10] sm:$0xff]  ;;  %v1325_v60 = vpack.c.bf16 %v1675_v30, %v1670_v29 }
   0xc   :  { %1314 = vmatprep.subr.bf16.mxu0 %v1313_v16  ;;  %v1699_v37 = vld [vmem:[%s2308_s1 + $0xc8] sm:$0xff]  ;;  %v1704_v38 = vld [vmem:[%s2308_s1 + $0xd8] sm:$0xff]  ;;  %v1709_v39 = vld [vmem:[%s2308_s1 + $0xc0] sm:$0xff]  ;;  %v79_v44 = vadd.f32 %v48_v34, %v47_v31  ;;  %v1327_v1 = vpack.c.bf16 %v1688_v33, %v1683_v32 }
   0xd   :  { %v1714_v40 = vld [vmem:[%s2308_s1 + $0xd0] sm:$0xff]  ;;  %v51_v41 = vld [vmem:[%s2307_s0 + $0x20] sm:$0xff]  ;;  %v52_v42 = vld [vmem:[%s2307_s0 + $0x28] sm:$0xff]  ;;  %v1329_v9 = vpack.c.bf16 %v1704_v38, %v1699_v37 }
   0xe   :  { %v53_v43 = vld [vmem:[%s2307_s0 + $0x30] sm:$0xff]  ;;  %v50_v46 = vld [vmem:[%s2307_s0 + $0x18] sm:$0xff]  ;;  %v55_v47 = vld [vmem:[%s2307_s0 + $0x40] sm:$0xff]  ;;  %v88_v49 = vadd.f32 %v52_v42, %v51_v41  ;;  %v80_v57 = vadd.f32 %v79_v44, %v49_v35  ;;  %v1331_v10 = vpack.c.bf16 %v1714_v40, %v1709_v39 }
   0xf   :  { %1316 = vmatpush1.bf16.msra.mxu0 %v1315_v21  ;;  %v56_v48 = vld [vmem:[%s2307_s0 + $0x48] sm:$0xff]  ;;  %v1742_v51 = vld [vmem:[%s2308_s1 + $0xf8] sm:$0xff]  ;;  %v1747_v52 = vld [vmem:[%s2308_s1 + $0xe0] sm:$0xff] }
  0x10   :  { %1318 = vmatprep.subr.bf16.mxu0 %v1317_v23  ;;  %v1737_v50 = vld [vmem:[%s2308_s1 + $0xe8] sm:$0xff]  ;;  %v1752_v53 = vld [vmem:[%s2308_s1 + $0xf0] sm:$0xff]  ;;  %v54_v54 = vld [vmem:[%s2307_s0 + $0x38] sm:$0xff]  ;;  %v97_v58 = vadd.f32 %v56_v48, %v55_v47  ;;  %v89_v0 = vadd.f32 %v88_v49, %v53_v43  ;;  %v81_v5 = vadd.f32 %v80_v57, %v50_v46 }
  0x11   :  { %v57_v55 = vld [vmem:[%s2307_s0 + $0x50] sm:$0xff]  ;;  %v59_v56 = vld [vmem:[%s2307_s0 + $0x60] sm:$0xff]  ;;  %v58_v61 = vld [vmem:[%s2307_s0 + $0x58] sm:$0xff]  ;;  %v1333_v23 = vpack.c.bf16 %v1742_v51, %v1737_v50  ;;  %v1335_v24 = vpack.c.bf16 %v1752_v53, %v1747_v52 }
  0x12   :  { %v60_v62 = vld [vmem:[%s2307_s0 + $0x68] sm:$0xff]  ;;  %v61_v63 = vld [vmem:[%s2307_s0 + $0x70] sm:$0xff]  ;;  %v63_v2 = vld [vmem:[%s2307_s0 + $0x80] sm:$0xff]  ;;  %v98_v6 = vadd.f32 %v97_v58, %v57_v55  ;;  %v90_v14 = vadd.f32 %v89_v0, %v54_v54  ;;  %v82_v19 = vrot.slane %v81_v5, 4 }
  0x13   :  { %1320 = vmatpush1.bf16.msra.mxu0 %v1319_v36  ;;  %v64_v3 = vld [vmem:[%s2307_s0 + $0x88] sm:$0xff]  ;;  %v65_v4 = vld [vmem:[%s2307_s0 + $0x90] sm:$0xff]  ;;  %v106_v7 = vadd.f32 %v60_v62, %v59_v56  ;;  %v62_v11 = vld [vmem:[%s2307_s0 + $0x78] sm:$0xff] }
  0x14   :  { %1322 = vmatprep.subr.bf16.mxu0 %v1321_v45  ;;  %v67_v12 = vld [vmem:[%s2307_s0 + $0xa0] sm:$0xff]  ;;  %v68_v13 = vld [vmem:[%s2307_s0 + $0xa8] sm:$0xff]  ;;  %v115_v15 = vadd.f32 %v64_v3, %v63_v2  ;;  %v66_v16 = vld [vmem:[%s2307_s0 + $0x98] sm:$0xff]  ;;  %v99_v20 = vadd.f32 %v98_v6, %v58_v61  ;;  %v91_v28 = vrot.slane %v90_v14, 4  ;;  %v83_v33 = vadd.f32 %v82_v19, %v81_v5 }
  0x15   :  { %v69_v17 = vld [vmem:[%s2307_s0 + $0xb0] sm:$0xff]  ;;  %v71_v18 = vld [vmem:[%s2307_s0 + $0xc0] sm:$0xff]  ;;  %v107_v21 = vadd.f32 %v106_v7, %v61_v63  ;;  %v124_v22 = vadd.f32 %v68_v13, %v67_v12  ;;  %v70_v25 = vld [vmem:[%s2307_s0 + $0xb8] sm:$0xff] }
  0x16   :  { %v72_v26 = vld [vmem:[%s2307_s0 + $0xc8] sm:$0xff]  ;;  %v73_v27 = vld [vmem:[%s2307_s0 + $0xd0] sm:$0xff]  ;;  %v116_v29 = vadd.f32 %v115_v15, %v65_v4  ;;  %v75_v30 = vld [vmem:[%s2307_s0 + $0xe0] sm:$0xff]  ;;  %v100_v34 = vrot.slane %v99_v20, 4  ;;  %v92_v37 = vadd.f32 %v91_v28, %v90_v14 }
  0x17   :  { %1324 = vmatpush1.bf16.msra.mxu0 %v1323_v59  ;;  %v76_v31 = vld [vmem:[%s2307_s0 + $0xe8] sm:$0xff]  ;;  %v77_v32 = vld [vmem:[%s2307_s0 + $0xf0] sm:$0xff]  ;;  %v108_v35 = vadd.f32 %v107_v21, %v62_v11  ;;  %v125_v36 = vadd.f32 %v124_v22, %v69_v17  ;;  %v133_v41 = vadd.f32 %v72_v26, %v71_v18 }
  0x18   :  { %1326 = vmatprep.subr.bf16.mxu0 %v1325_v60  ;;  %v117_v38 = vadd.f32 %v116_v29, %v66_v16  ;;  %v142_v42 = vadd.f32 %v76_v31, %v75_v30 }
  0x19   :  { %20 = vsyncpa [#allocation4], 0  ;;  %v74_v43 = vld [vmem:[%s2307_s0 + $0xd8] sm:$0xff]  ;;  %v84_v45 = vrot.slane %v83_v33, 2  ;;  %v101_v46 = vadd.f32 %v100_v34, %v99_v20  ;;  %v109_v47 = vrot.slane %v108_v35, 4  ;;  %v126_v48 = vadd.f32 %v125_v36, %v70_v25 }
  0x1a   :  { %v78_v44 = vld [vmem:[%s2307_s0 + $0xf8] sm:$0xff]  ;;  %v93_v49 = vrot.slane %v92_v37, 2  ;;  %v118_v50 = vrot.slane %v117_v38, 4  ;;  %v134_v51 = vadd.f32 %v133_v41, %v73_v27  ;;  %v143_v54 = vadd.f32 %v142_v42, %v77_v32 }
  0x1b   :  { %1328 = vmatpush1.bf16.msra.mxu0 %v1327_v1  ;;  %v85_v55 = vadd.f32 %v84_v45, %v83_v33  ;;  %v102_v56 = vrot.slane %v101_v46, 2  ;;  %v110_v57 = vadd.f32 %v109_v47, %v108_v35  ;;  %v127_v58 = vrot.slane %v126_v48, 4 }
  0x1c   :  { %1330 = vmatprep.subr.bf16.mxu0 %v1329_v9  ;;  %v94_v59 = vadd.f32 %v93_v49, %v92_v37  ;;  %v119_v60 = vadd.f32 %v118_v50, %v117_v38  ;;  %v135_v61 = vadd.f32 %v134_v51, %v74_v43  ;;  %v144_v62 = vadd.f32 %v143_v54, %v78_v44  ;;  %v183_v38 = vld [vmem:[%s2309_s2] sm:$0x3]  ;;  %v352_v50 = vld [vmem:[%s2312_s5 + $0x88] sm:$0xff] }
  0x1d   :  { %v86_v63 = vrot.slane %v85_v55, 1  ;;  %v103_v0 = vadd.f32 %v102_v56, %v101_v46  ;;  %v111_v2 = vrot.slane %v110_v57, 2  ;;  %v128_v3 = vadd.f32 %v127_v58, %v126_v48  ;;  %v351_v49 = vld [vmem:[%s2312_s5 + $0x80] sm:$0xff] }
  0x1e   :  { %v95_v4 = vrot.slane %v94_v59, 1  ;;  %v120_v5 = vrot.slane %v119_v60, 2  ;;  %v136_v6 = vrot.slane %v135_v61, 4  ;;  %v145_v7 = vrot.slane %v144_v62, 4  ;;  %v335_v51 = vld [vmem:[%s2312_s5] sm:$0xff] }
  0x1f   :  { %1332 = vmatpush1.bf16.msra.mxu0 %v1331_v10  ;;  %v87_v1 = vadd.f32 %v86_v63, %v85_v55  ;;  %v104_v11 = vrot.slane %v103_v0, 1  ;;  %v112_v12 = vadd.f32 %v111_v2, %v110_v57  ;;  %v129_v9 = vrot.slane %v128_v3, 2  ;;  %v336_v55 = vld [vmem:[%s2312_s5 + $0x8] sm:$0xff]  ;;  %v1043_v56 = vld [vmem:[%s2312_s5 + $0x180] sm:$0xff]  ;;  %v337_v2 = vld [vmem:[%s2312_s5 + $0x10] sm:$0xff] }
  0x20   :  { %1334 = vmatprep.subr.bf16.mxu0 %v1333_v23  ;;  %v96_v13 = vadd.f32 %v95_v4, %v94_v59  ;;  %v121_v14 = vadd.f32 %v120_v5, %v119_v60  ;;  %v137_v15 = vadd.f32 %v136_v6, %v135_v61  ;;  %v146_v16 = vadd.f32 %v145_v7, %v144_v62  ;;  %v1044_v57 = vld [vmem:[%s2312_s5 + $0x188] sm:$0xff]  ;;  %v1027_v60 = vld [vmem:[%s2312_s5 + $0x100] sm:$0xff]  ;;  %v353_v62 = vld [vmem:[%s2312_s5 + $0x90] sm:$0xff] }
  0x21   :  { %v105_v17 = vadd.f32 %v104_v11, %v103_v0  ;;  %v113_v18 = vrot.slane %v112_v12, 1  ;;  %v130_v19 = vadd.f32 %v129_v9, %v128_v3  ;;  %vm207_vm2 = vcmask 1043459   ;;  %v1028_v61 = vld [vmem:[%s2312_s5 + $0x108] sm:$0xff]  ;;  %v354_v0 = vld [vmem:[%s2312_s5 + $0x98] sm:$0xff]  ;;  %v1045_v6 = vld [vmem:[%s2312_s5 + $0x190] sm:$0xff] }
  0x22   :  { %v122_v20 = vrot.slane %v121_v14, 1  ;;  %v138_v21 = vrot.slane %v137_v15, 2  ;;  %v147_v22 = vrot.slane %v146_v16, 2  ;;  %v204_v25 = vsel %vm203_vm0, %v96_v13, %v87_v1  ;;  %v338_v3 = vld [vmem:[%s2312_s5 + $0x18] sm:$0xff]  ;;  %v1029_v1 = vld [vmem:[%s2312_s5 + $0x110] sm:$0xff]  ;;  %v355_v9 = vld [vmem:[%s2312_s5 + $0xa0] sm:$0xff] }
  0x23   :  { %1336 = vmatpush1.bf16.msra.mxu0 %v1335_v24  ;;  %v114_v39 = vadd.f32 %v113_v18, %v112_v12  ;;  %v131_v40 = vrot.slane %v130_v19, 1  ;;  %v206_v10 = vsel %vm205_vm1, %v105_v17, %v204_v25  ;;  %vm209_vm3 = vcmask 1044484   ;;  %v1046_v7 = vld [vmem:[%s2312_s5 + $0x198] sm:$0xff]  ;;  %v356_v13 = vld [vmem:[%s2312_s5 + $0xa8] sm:$0xff]  ;;  %v1047_v18 = vld [vmem:[%s2312_s5 + $0x1a0] sm:$0xff] }
  0x24   :  { %v123_v23 = vadd.f32 %v122_v20, %v121_v14  ;;  %v139_v26 = vadd.f32 %v138_v21, %v137_v15  ;;  %v148_v27 = vadd.f32 %v147_v22, %v146_v16  ;;  %vm211_vm4 = vcmask 1045509   ;;  %v1030_v12 = vld [vmem:[%s2312_s5 + $0x118] sm:$0xff]  ;;  %v339_v16 = vld [vmem:[%s2312_s5 + $0x20] sm:$0xff]  ;;  %v340_v17 = vld [vmem:[%s2312_s5 + $0x28] sm:$0xff] }
  0x25   :  { %v132_v28 = vadd.f32 %v131_v40, %v130_v19  ;;  %v208_v29 = vsel %vm207_vm2, %v114_v39, %v206_v10  ;;  %vm213_vm5 = vcmask 1046534   ;;  %vm215_vm6 = vcmask 1047559   ;;  %v1048_v19 = vld [vmem:[%s2312_s5 + $0x1a8] sm:$0xff]  ;;  %v1031_v20 = vld [vmem:[%s2312_s5 + $0x120] sm:$0xff] }
  0x26   :  { %v140_v30 = vrot.slane %v139_v26, 1  ;;  %v149_v31 = vrot.slane %v148_v27, 1  ;;  %v210_v32 = vsel %vm209_vm3, %v123_v23, %v208_v29  ;;  %v185_v24 = vlaneseq  ;;  %v1032_v21 = vld [vmem:[%s2312_s5 + $0x128] sm:$0xff] }
  0x27   :  { %v212_v33 = vsel %vm211_vm4, %v132_v28, %v210_v32  ;;  %v1337_v54 = vpack.c.bf16 %v352_v50, %v351_v49  ;;  %v1339_v58 = vpack.c.bf16 %v336_v55, %v335_v51  ;;  %v1369_v59 = vpack.c.bf16 %v1044_v57, %v1043_v56  ;;  %v344_v49 = vld [vmem:[%s2312_s5 + $0x48] sm:$0xff]  ;;  %v1051_v50 = vld [vmem:[%s2312_s5 + $0x1c0] sm:$0xff] }
  0x28   :  { %v141_v34 = vadd.f32 %v140_v30, %v139_v26  ;;  %v150_v35 = vadd.f32 %v149_v31, %v148_v27  ;;  %v1846_v36 = vshrl.u32 %v185_v24, 7  ;;  %v1371_v63 = vpack.c.bf16 %v1028_v61, %v1027_v60  ;;  %v357_v30 = vld [vmem:[%s2312_s5 + $0xb0] sm:$0xff]  ;;  %v358_v31 = vld [vmem:[%s2312_s5 + $0xb8] sm:$0xff]  ;;  %v1035_v55 = vld [vmem:[%s2312_s5 + $0x140] sm:$0xff] }
  0x29   :  { %1338 = vmatprep.subr.bf16.mxu1 %v1337_v54  ;;  %1370 = vmatprep.subr.bf16.mxu0 %v1369_v59  ;;  %v1341_v4 = vpack.c.bf16 %v354_v0, %v353_v62  ;;  %v1343_v5 = vpack.c.bf16 %v338_v3, %v337_v2  ;;  %v1373_v11 = vpack.c.bf16 %v1046_v7, %v1045_v6  ;;  %v1052_v54 = vld [vmem:[%s2312_s5 + $0x1c8] sm:$0xff]  ;;  %v361_v59 = vld [vmem:[%s2312_s5 + $0xd0] sm:$0xff]  ;;  %v362_v60 = vld [vmem:[%s2312_s5 + $0xd8] sm:$0xff]  ;;  %vm1526_vm7 = vmmov 0  }
  0x2a   :  { %v214_v52 = vsel %vm213_vm5, %v141_v34, %v212_v33  ;;  %v1849_v37 = vsub.s32 0, %v1846_v36  ;;  %v1855_v41 = vsub.s32 1, %v1846_v36  ;;  %1340 = vmatpush3.bf16.msra.mxu1 %v1339_v58  ;;  %v1375_v14 = vpack.c.bf16 %v1030_v12, %v1029_v1  ;;  %v341_v33 = vld [vmem:[%s2312_s5 + $0x30] sm:$0xff]  ;;  %v342_v34 = vld [vmem:[%s2312_s5 + $0x38] sm:$0xff]  ;;  %v1036_v56 = vld [vmem:[%s2312_s5 + $0x148] sm:$0xff] }
  0x2b   :  { %v216_v53 = vsel %vm215_vm6, %v150_v35, %v214_v52  ;;  %1342 = vmatprep.subr.bf16.mxu1 %v1341_v4  ;;  %v1345_v15 = vpack.c.bf16 %v356_v13, %v355_v9  ;;  %v1347_v22 = vpack.c.bf16 %v340_v17, %v339_v16  ;;  %v1377_v25 = vpack.c.bf16 %v1048_v19, %v1047_v18  ;;  %v1049_v35 = vld [vmem:[%s2312_s5 + $0x1b0] sm:$0xff]  ;;  %v1054_v2 = vld [vmem:[%s2312_s5 + $0x1d8] sm:$0xff]  ;;  %v363_v7 = vld [vmem:[%s2312_s5 + $0xe0] sm:$0xff] }
  0x2c   :  { %283 = vmatmul.mubr.f32.vlgmr.msra.gmra.mrb[0].mxu0 %v216_v53  ;;  %v188_v42 = vrot.slane %v183_v38, %v1849_v37  ;;  %v192_v43 = vrot.slane %v183_v38, %v1855_v41  ;;  %v1379_v39 = vpack.c.bf16 %v1032_v21, %v1031_v20  ;;  %v1349_v32 = vpack.c.bf16 %v358_v31, %v357_v30  ;;  %v1050_v53 = vld [vmem:[%s2312_s5 + $0x1b8] sm:$0xff]  ;;  %v1033_v38 = vld [vmem:[%s2312_s5 + $0x130] sm:$0xff]  ;;  %v347_v12 = vld [vmem:[%s2312_s5 + $0x60] sm:$0xff] }
  0x2d   :  { %1372 = vmatpush3.bf16.msra.mxu0 %v1371_v63  ;;  %v1351_v52 = vpack.c.bf16 %v342_v34, %v341_v33  ;;  %v1385_v57 = vpack.c.bf16 %v1052_v54, %v1051_v50  ;;  %v1387_v58 = vpack.c.bf16 %v1036_v56, %v1035_v55  ;;  %v345_v61 = vld [vmem:[%s2312_s5 + $0x50] sm:$0xff]  ;;  %v1357_v62 = vpack.c.bf16 %v362_v60, %v361_v59  ;;  %v346_v63 = vld [vmem:[%s2312_s5 + $0x58] sm:$0xff]  ;;  %v348_v9 = vld [vmem:[%s2312_s5 + $0x68] sm:$0xff] }
  0x2e   :  { %1374 = vmatprep.subr.bf16.mxu0 %v1373_v11  ;;  %1344 = vmatpush3.bf16.msra.mxu1 %v1343_v5  ;;  %v1053_v0 = vld [vmem:[%s2312_s5 + $0x1d0] sm:$0xff]  ;;  %v1359_v3 = vpack.c.bf16 %v346_v63, %v345_v61  ;;  %v1038_v6 = vld [vmem:[%s2312_s5 + $0x158] sm:$0xff]  ;;  %v364_v11 = vld [vmem:[%s2312_s5 + $0xe8] sm:$0xff]  ;;  %v1363_v17 = vpack.c.bf16 %v348_v9, %v347_v12  ;;  %vm689_vm8 = vcmask 523264   ;;  %vm1010_vm9 = vcmask 57344  }
  0x2f   :  { %1346 = vmatprep.subr.bf16.mxu1 %v1345_v15  ;;  %v1389_v4 = vpack.c.bf16 %v1054_v2, %v1053_v0  ;;  %v1037_v5 = vld [vmem:[%s2312_s5 + $0x150] sm:$0xff]  ;;  %v1361_v13 = vpack.c.bf16 %v364_v11, %v363_v7  ;;  %v1056_v15 = vld [vmem:[%s2312_s5 + $0x1e8] sm:$0xff]  ;;  %v1039_v16 = vld [vmem:[%s2312_s5 + $0x160] sm:$0xff] }
  0x30   :  { %v1391_v1 = vpack.c.bf16 %v1038_v6, %v1037_v5  ;;  %v1040_v19 = vld [vmem:[%s2312_s5 + $0x168] sm:$0xff]  ;;  %v365_v20 = vld [vmem:[%s2312_s5 + $0xf0] sm:$0xff]  ;;  %v366_v21 = vld [vmem:[%s2312_s5 + $0xf8] sm:$0xff] }
  0x31   :  { %1376 = vmatpush3.bf16.msra.mxu0 %v1375_v14  ;;  %v1055_v14 = vld [vmem:[%s2312_s5 + $0x1e0] sm:$0xff]  ;;  %v1042_v30 = vld [vmem:[%s2312_s5 + $0x178] sm:$0xff]  ;;  %v1077_v34 = vld [vmem:[%s2312_s5 + $0x288] sm:$0xff] }
  0x32   :  { %1378 = vmatprep.subr.bf16.mxu0 %v1377_v25  ;;  %1348 = vmatpush3.bf16.msra.mxu1 %v1347_v22  ;;  %v1393_v18 = vpack.c.bf16 %v1056_v15, %v1055_v14  ;;  %v1365_v22 = vpack.c.bf16 %v366_v21, %v365_v20  ;;  %v349_v25 = vld [vmem:[%s2312_s5 + $0x70] sm:$0xff]  ;;  %v1076_v33 = vld [vmem:[%s2312_s5 + $0x280] sm:$0xff]  ;;  %v1061_v54 = vld [vmem:[%s2312_s5 + $0x208] sm:$0xff] }
  0x33   :  { %1350 = vmatprep.subr.bf16.mxu1 %v1349_v32  ;;  %v1062_v61 = vld [vmem:[%s2312_s5 + $0x210] sm:$0xff]  ;;  %v1080_v63 = vld [vmem:[%s2312_s5 + $0x2a0] sm:$0xff]  ;;  %v1081_v0 = vld [vmem:[%s2312_s5 + $0x2a8] sm:$0xff] }
  0x34   :  { %v1065_v5 = vld [vmem:[%s2312_s5 + $0x228] sm:$0xff]  ;;  %v1082_v6 = vld [vmem:[%s2312_s5 + $0x2b0] sm:$0xff]  ;;  %v1083_v7 = vld [vmem:[%s2312_s5 + $0x2b8] sm:$0xff] }
  0x35   :  { %1380 = vmatpush3.bf16.msra.mxu0 %v1379_v39  ;;  %v350_v39 = vld [vmem:[%s2312_s5 + $0x78] sm:$0xff]  ;;  %v1413_v11 = vpack.c.bf16 %v1083_v7, %v1082_v6  ;;  %v1066_v12 = vld [vmem:[%s2312_s5 + $0x230] sm:$0xff]  ;;  %v1085_v14 = vld [vmem:[%s2312_s5 + $0x2c8] sm:$0xff] }
  0x36   :  { %1352 = vmatpush3.bf16.msra.mxu1 %v1351_v52  ;;  %v1367_v31 = vpack.c.bf16 %v350_v39, %v349_v25  ;;  %v1067_v9 = vld [vmem:[%s2312_s5 + $0x238] sm:$0xff]  ;;  %v1070_v25 = vld [vmem:[%s2312_s5 + $0x250] sm:$0xff] }
  0x37   :  { %v1415_v15 = vpack.c.bf16 %v1067_v9, %v1066_v12  ;;  %v1087_v20 = vld [vmem:[%s2312_s5 + $0x2d8] sm:$0xff] }
  0x38   :  { %v1071_v39 = vld [vmem:[%s2312_s5 + $0x258] sm:$0xff] }
  0xff   :  { %v284_v44 = vpop.f32.mrb[0].mxu0 }
 0x100   :  { %v285_v45 = vadd.f32 %v284_v44, %v188_v42  ;;  %v286_v46 = vpop.f32.mrb[1].mxu0  ;;  %v1034_v42 = vld [vmem:[%s2312_s5 + $0x138] sm:$0xff] }
 0x101   :  { %v287_v47 = vadd.f32 %v286_v46, %v192_v43  ;;  %v1381_v43 = vpack.c.bf16 %v1050_v53, %v1049_v35  ;;  %v1383_v44 = vpack.c.bf16 %v1034_v42, %v1033_v38  ;;  %v360_v46 = vld [vmem:[%s2312_s5 + $0xc8] sm:$0xff]  ;;  %v1401_v35 = vpack.c.bf16 %v1077_v34, %v1076_v33  ;;  %v289_v42 = vld [vmem:[%s2310_s3] sm:$0x3] }
 0x103   :  { %v291_v48 = vadd.f32 %v287_v47, %v285_v45  ;;  %1382 = vmatprep.subr.bf16.mxu0 %v1381_v43  ;;  %v290_v43 = vld [vmem:[%s2311_s4] sm:$0x3] }
 0x104   :  { %1384 = vmatpush3.bf16.msra.mxu0 %v1383_v44  ;;  %v316_v44 = vrot.slane %v289_v42, %v1855_v41  ;;  %v325_v50 = vrot.slane %v290_v43, %v1849_v37 }
 0x105   :  { %292 = vadd.xlane.f32.xlu0 %v291_v48  ;;  %v343_v48 = vld [vmem:[%s2312_s5 + $0x40] sm:$0xff]  ;;  %1386 = vmatprep.subr.bf16.mxu0 %v1385_v57 }
 0x106   :  { %v1355_v51 = vpack.c.bf16 %v344_v49, %v343_v48  ;;  %v329_v48 = vrot.slane %v290_v43, %v1855_v41 }
 0x108   :  { %1388 = vmatpush3.bf16.msra.mxu0 %v1387_v58 }
 0x109   :  { %1390 = vmatprep.subr.bf16.mxu0 %v1389_v4  ;;  %v1064_v4 = vld [vmem:[%s2312_s5 + $0x220] sm:$0xff] }
 0x10c   :  { %1392 = vmatpush3.bf16.msra.mxu0 %v1391_v1  ;;  %v1411_v1 = vpack.c.bf16 %v1065_v5, %v1064_v4 }
 0x10d   :  { %1394 = vmatprep.subr.bf16.mxu0 %v1393_v18  ;;  %v1069_v18 = vld [vmem:[%s2312_s5 + $0x248] sm:$0xff] }
 0x192   :  { %v293_v40 = vpop.xlane.xlu0 %292 }
 0x193   :  { %v295_v10 = vmul.f32 0.00390625, %v293_v40  ;;  %v1057_v40 = vld [vmem:[%s2312_s5 + $0x1f0] sm:$0xff] }
 0x195   :  { %v1931_v23 = vsub.f32 %v285_v45, %v295_v10  ;;  %v1933_v26 = vsub.f32 %v287_v47, %v295_v10  ;;  %v359_v45 = vld [vmem:[%s2312_s5 + $0xc0] sm:$0xff]  ;;  %v1395_v10 = vpack.c.bf16 %v1040_v19, %v1039_v16  ;;  %v1086_v19 = vld [vmem:[%s2312_s5 + $0x2d0] sm:$0xff] }
 0x196   :  { %v1353_v47 = vpack.c.bf16 %v360_v46, %v359_v45  ;;  %v312_v45 = vrot.slane %v289_v42, %v1849_v37  ;;  %v678_v42 = vld [vmem:[%s2314_s7 + $0x8] sm:$0xff] }
 0x197   :  { %v298_v27 = vmul.f32 %v1931_v23, %v1931_v23  ;;  %v299_v28 = vmul.f32 %v1933_v26, %v1933_v26  ;;  %1396 = vmatpush3.bf16.msra.mxu0 %v1395_v10  ;;  %v1089_v10 = vld [vmem:[%s2312_s5 + $0x2e8] sm:$0xff] }
 0x198   :  { %1354 = vmatprep.subr.bf16.mxu1 %v1353_v47 }
 0x199   :  { %v300_v29 = vadd.f32 %v299_v28, %v298_v27  ;;  %1356 = vmatpush3.bf16.msra.mxu1 %v1355_v51  ;;  %v1058_v27 = vld [vmem:[%s2312_s5 + $0x1f8] sm:$0xff]  ;;  %v1060_v51 = vld [vmem:[%s2312_s5 + $0x200] sm:$0xff] }
 0x19a   :  { %1358 = vmatprep.subr.bf16.mxu1 %v1357_v62  ;;  %v1397_v28 = vpack.c.bf16 %v1058_v27, %v1057_v40  ;;  %v1403_v59 = vpack.c.bf16 %v1061_v54, %v1060_v51  ;;  %v1063_v62 = vld [vmem:[%s2312_s5 + $0x218] sm:$0xff]  ;;  %v1088_v40 = vld [vmem:[%s2312_s5 + $0x2e0] sm:$0xff]  ;;  %v1423_v27 = vpack.c.bf16 %v1071_v39, %v1070_v25  ;;  %v1096_v51 = vld [vmem:[%s2314_s7 + $0x50] sm:$0xff] }
 0x19b   :  { %301 = vadd.xlane.f32.xlu0 %v300_v29  ;;  %v1041_v29 = vld [vmem:[%s2312_s5 + $0x170] sm:$0xff]  ;;  %v1407_v2 = vpack.c.bf16 %v1063_v62, %v1062_v61  ;;  %v1097_v54 = vld [vmem:[%s2314_s7 + $0x58] sm:$0xff] }
 0x19c   :  { %v1399_v32 = vpack.c.bf16 %v1042_v30, %v1041_v29  ;;  %1398 = vmatprep.subr.bf16.mxu0 %v1397_v28  ;;  %v1425_v28 = vpack.c.bf16 %v1089_v10, %v1088_v40  ;;  %v1072_v29 = vld [vmem:[%s2312_s5 + $0x260] sm:$0xff]  ;;  %v1073_v30 = vld [vmem:[%s2312_s5 + $0x268] sm:$0xff]  ;;  %v684_v61 = vld [vmem:[%s2314_s7 + $0x38] sm:$0xff] }
 0x19d   :  { %1360 = vmatpush3.bf16.msra.mxu1 %v1359_v3  ;;  %v1409_v3 = vpack.c.bf16 %v1081_v0, %v1080_v63  ;;  %v1427_v33 = vpack.c.bf16 %v1073_v30, %v1072_v29  ;;  %v1100_v62 = vld [vmem:[%s2314_s7 + $0x70] sm:$0xff]  ;;  %v1101_v63 = vld [vmem:[%s2314_s7 + $0x78] sm:$0xff] }
 0x19e   :  { %1362 = vmatprep.subr.bf16.mxu1 %v1361_v13  ;;  %1400 = vmatpush3.bf16.msra.mxu0 %v1399_v32  ;;  %v1084_v13 = vld [vmem:[%s2312_s5 + $0x2c0] sm:$0xff]  ;;  %v1091_v32 = vld [vmem:[%s2312_s5 + $0x2f8] sm:$0xff] }
 0x19f   :  { %v1417_v16 = vpack.c.bf16 %v1085_v14, %v1084_v13 }
 0x1a1   :  { %1364 = vmatpush3.bf16.msra.mxu1 %v1363_v17  ;;  %v1068_v17 = vld [vmem:[%s2312_s5 + $0x240] sm:$0xff] }
 0x1a2   :  { %1366 = vmatprep.subr.bf16.mxu1 %v1365_v22  ;;  %v1419_v21 = vpack.c.bf16 %v1069_v18, %v1068_v17  ;;  %v1421_v22 = vpack.c.bf16 %v1087_v20, %v1086_v19  ;;  %v595_v19 = vsub.s32 2, %v1846_v36  ;;  %v669_v20 = vsub.s32 3, %v1846_v36 }
 0x1a5   :  { %1368 = vmatpush3.bf16.msra.mxu1 %v1367_v31  ;;  %v1090_v31 = vld [vmem:[%s2312_s5 + $0x2f0] sm:$0xff] }
 0x1a6   :  { %1402 = vmatprep.subr.bf16.mxu1 %v1401_v35  ;;  %v1429_v34 = vpack.c.bf16 %v1091_v32, %v1090_v31  ;;  %v1074_v35 = vld [vmem:[%s2312_s5 + $0x270] sm:$0xff] }
 0x228   :  { %v302_v52 = vpop.xlane.xlu0 %301 }
 0x229   :  { %v303_v53 = vmul.f32 0.00390625, %v302_v52  ;;  %v1075_v52 = vld [vmem:[%s2312_s5 + $0x278] sm:$0xff] }
 0x22b   :  { %v304_v38 = vadd.f32 1e-05, %v303_v53  ;;  %v1431_v53 = vpack.c.bf16 %v1075_v52, %v1074_v35 }
 0x22d   :  { %1476 = vrsqrt.f32 %v304_v38  ;;  %v677_v38 = vld [vmem:[%s2314_s7] sm:$0xff] }
 0x22e   :  { %v1434_v43 = vpack.c.bf16 %v678_v42, %v677_v38  ;;  %v1106_v42 = vld [vmem:[%s2314_s7 + $0x90] sm:$0xff] }
 0x237   :  { %v1477_v46 = vpop.eup %1476 }
 0x238   :  { %v307_v47 = vmul.f32 %v1477_v46, %v1933_v26  ;;  %v306_v49 = vmul.f32 %v1477_v46, %v1931_v23  ;;  %v1078_v26 = vld [vmem:[%s2312_s5 + $0x290] sm:$0xff]  ;;  %v1079_v23 = vld [vmem:[%s2312_s5 + $0x298] sm:$0xff]  ;;  %v1525_v46 = vmov 0.0|0.0  }
 0x239   :  { %v1405_v60 = vpack.c.bf16 %v1079_v23, %v1078_v26  ;;  %1433 = vmatprep.subr.bf16.mxu0 %v1525_v46  ;;  %v682_v26 = vld [vmem:[%s2314_s7 + $0x28] sm:$0xff]  ;;  %v1098_v23 = vld [vmem:[%s2314_s7 + $0x60] sm:$0xff] }
 0x23a   :  { %v320_v55 = vmul.f32 %v316_v44, %v307_v47  ;;  %v319_v56 = vmul.f32 %v312_v45, %v306_v49  ;;  %v1094_v44 = vld [vmem:[%s2314_s7 + $0x40] sm:$0xff]  ;;  %v1095_v45 = vld [vmem:[%s2314_s7 + $0x48] sm:$0xff]  ;;  %v680_v49 = vld [vmem:[%s2314_s7 + $0x18] sm:$0xff] }
 0x23b   :  { %v1446_v47 = vpack.c.bf16 %v1095_v45, %v1094_v44  ;;  %v1108_v45 = vld [vmem:[%s2314_s7 + $0xa0] sm:$0xff] }
 0x23c   :  { %v333_v57 = vadd.f32 %v329_v48, %v320_v55  ;;  %v332_v58 = vadd.f32 %v325_v50, %v319_v56  ;;  %v679_v48 = vld [vmem:[%s2314_s7 + $0x10] sm:$0xff]  ;;  %v1449_v55 = vpack.c.bf16 %v1097_v54, %v1096_v51  ;;  %v681_v56 = vld [vmem:[%s2314_s7 + $0x20] sm:$0xff] }
 0x23d   :  { %v1437_v50 = vpack.c.bf16 %v680_v49, %v679_v48  ;;  %v1110_v49 = vld [vmem:[%s2314_s7 + $0xb0] sm:$0xff]  ;;  %v676_v51 = vld [vmem:[%s2315_s8] sm:$0xf] }
 0x23e   :  { %435 = vmatprep.mubr.f32.mxu1 %v333_v57  ;;  %548 = vmatprep.mubr.f32.mxu0 %v333_v57  ;;  %v688_v54 = vrot.slane %v676_v51, %v1849_v37 }
 0x23f   :  { %436 = vmatmul.mubr.f32.vlgmr.msra.gmra.mrb[0].mxu1 %v332_v58  ;;  %549 = vmatmul.mubr.f32.vlgmr.msra.gmra.mrb[2].mxu0 %v332_v58 }
 0x240   :  { %1404 = vmatpush3.bf16.msra.mxu1 %v1403_v59  ;;  %661 = vmatprep.mubr.f32.mxu1 %v333_v57  ;;  %v1440_v57 = vpack.c.bf16 %v682_v26, %v681_v56  ;;  %v781_v56 = vrot.slane %v676_v51, %v1855_v41 }
 0x241   :  { %1406 = vmatprep.subr.bf16.mxu1 %v1405_v60  ;;  %1435 = vmatpush3.bf16.msra.mxu0 %v1434_v43  ;;  %v683_v60 = vld [vmem:[%s2314_s7 + $0x30] sm:$0xff]  ;;  %v1107_v43 = vld [vmem:[%s2314_s7 + $0x98] sm:$0xff] }
 0x242   :  { %1436 = vmatprep.subr.bf16.mxu0 %v1525_v46  ;;  %1264 = vmatprep.mubr.msk.f32.mxu0 %vm1526_vm7, %v1524_v8  ;;  %v1443_v0 = vpack.c.bf16 %v684_v61, %v683_v60  ;;  %v1461_v44 = vpack.c.bf16 %v1107_v43, %v1106_v42 }
 0x244   :  { %1408 = vmatpush3.bf16.msra.mxu1 %v1407_v2  ;;  %v1455_v2 = vpack.c.bf16 %v1101_v63, %v1100_v62 }
 0x245   :  { %1410 = vmatprep.subr.bf16.mxu1 %v1409_v3  ;;  %1438 = vmatpush3.bf16.msra.mxu0 %v1437_v50  ;;  %v334_v3 = vld [vmem:[%s2313_s6] sm:$0xf] }
 0x246   :  { %1439 = vmatprep.subr.bf16.mxu0 %v1525_v46  ;;  %v370_v6 = vrot.slane %v334_v3, %v1849_v37  ;;  %v483_v14 = vrot.slane %v334_v3, %v1855_v41  ;;  %v596_v39 = vrot.slane %v334_v3, %v595_v19  ;;  %v670_v40 = vrot.slane %v334_v3, %v669_v20 }
 0x247   :  { %v944_v41 = vrot.slane %v676_v51, %v669_v20  ;;  %v991_v20 = vld [vmem:[#allocation2] sm:$0x1] }
 0x248   :  { %1412 = vmatpush3.bf16.msra.mxu1 %v1411_v1 }
 0x249   :  { %1414 = vmatprep.subr.bf16.mxu1 %v1413_v11  ;;  %1441 = vmatpush3.bf16.msra.mxu0 %v1440_v57 }
 0x24a   :  { %1442 = vmatprep.subr.bf16.mxu0 %v1525_v46 }
 0x24c   :  { %1416 = vmatpush3.bf16.msra.mxu1 %v1415_v15 }
 0x24d   :  { %1418 = vmatprep.subr.bf16.mxu1 %v1417_v16  ;;  %1444 = vmatpush3.bf16.msra.mxu0 %v1443_v0 }
 0x24e   :  { %1457 = vmatprep.subr.bf16.mxu0 %v1525_v46 }
 0x250   :  { %1420 = vmatpush3.bf16.msra.mxu1 %v1419_v21 }
 0x251   :  { %1422 = vmatprep.subr.bf16.mxu1 %v1421_v22 }
 0x254   :  { %1424 = vmatpush3.bf16.msra.mxu1 %v1423_v27 }
 0x255   :  { %1426 = vmatprep.subr.bf16.mxu1 %v1425_v28 }
 0x258   :  { %1428 = vmatpush3.bf16.msra.mxu1 %v1427_v33  ;;  %v1104_v33 = vld [vmem:[%s2314_s7 + $0x80] sm:$0xff] }
 0x259   :  { %1430 = vmatprep.subr.bf16.mxu1 %v1429_v34  ;;  %v1105_v34 = vld [vmem:[%s2314_s7 + $0x88] sm:$0xff] }
 0x25c   :  { %1432 = vmatpush3.bf16.msra.mxu1 %v1431_v53  ;;  %v1458_v53 = vpack.c.bf16 %v1105_v34, %v1104_v33 }
 0x25d   :  { %1445 = vmatprep.subr.bf16.mxu1 %v1525_v46 }
 0x25f   :  { %662 = vmatmul.mubr.f32.vlgmr.msra.gmra.mrb[2].mxu1 %v332_v58  ;;  %v1099_v58 = vld [vmem:[%s2314_s7 + $0x68] sm:$0xff] }
 0x260   :  { %1447 = vmatpush3.bf16.msra.mxu1 %v1446_v47  ;;  %v1452_v59 = vpack.c.bf16 %v1099_v58, %v1098_v23  ;;  %1283 = vmatprep.mubr.msk.f32.mxu1 %vm1526_vm7, %v1524_v8  ;;  %v1109_v47 = vld [vmem:[%s2314_s7 + $0xa8] sm:$0xff] }
 0x261   :  { %1448 = vmatprep.subr.bf16.mxu1 %v1525_v46  ;;  %v1464_v48 = vpack.c.bf16 %v1109_v47, %v1108_v45 }
 0x264   :  { %1450 = vmatpush3.bf16.msra.mxu1 %v1449_v55 }
 0x265   :  { %1451 = vmatprep.subr.bf16.mxu1 %v1525_v46 }
 0x268   :  { %1453 = vmatpush3.bf16.msra.mxu1 %v1452_v59 }
 0x269   :  { %1454 = vmatprep.subr.bf16.mxu1 %v1525_v46 }
 0x26c   :  { %1456 = vmatpush3.bf16.msra.mxu1 %v1455_v2 }
 0x312   :  { %v1148_v4 = vpop.f32.mrb[0].mxu1  ;;  %v1183_v5 = vpop.f32.mrb[2].mxu0 }
 0x313   :  { %v1149_v7 = vpop.f32.mrb[1].mxu1  ;;  %v1184_v1 = vpop.f32.mrb[3].mxu0 }
 0x314   :  { %v1150_v11 = vadd.f32 %v1149_v7, %v1148_v4  ;;  %v1185_v12 = vadd.f32 %v1184_v1, %v1183_v5  ;;  %v870_v4 = vrot.slane %v676_v51, %v595_v19 }
 0x316   :  { %v438_v9 = vadd.f32 %v1150_v11, %v370_v6  ;;  %v551_v15 = vadd.f32 %v1185_v12, %v483_v14 }
 0x318   :  { %v1026_v13 = vmul.f32 -1.442695, %v438_v9  ;;  %v1059_v16 = vmul.f32 -1.442695, %v551_v15 }
 0x31a   :  { %1478 = vpow2.f32 %v1026_v13 }
 0x31b   :  { %1480 = vpow2.f32 %v1059_v16 }
 0x324   :  { %v1479_v17 = vpop.eup %1478 }
 0x325   :  { %v444_v18 = vadd.f32 1.0, %v1479_v17  ;;  %v1481_v21 = vpop.eup %1480 }
 0x326   :  { %v557_v22 = vadd.f32 1.0, %v1481_v21  ;;  %v1527_v21 = vmov 0  }
 0x327   :  { %1482 = vrcp.f32 %v444_v18  ;;  %1474 = vset.pattern.permute.xlu1 %v1527_v21  ;;  %1475 = vset.pattern.permute.xlu0 %v1527_v21 }
 0x328   :  { %1484 = vrcp.f32 %v557_v22 }
 0x331   :  { %v1483_v10 = vpop.eup %1482 }
 0x332   :  { %v1218_v25 = vpop.f32.mrb[2].mxu1  ;;  %v671_v30 = vmul.f32 %v1483_v10, %v670_v40  ;;  %v1485_v32 = vpop.eup %1484  ;;  %v1113_v10 = vld [vmem:[%s2316_s9] ss:$0 sm:$0xff]  ;;  %s1528_s9 = smov [#allocation3]  }
 0x333   :  { %v1219_v27 = vpop.f32.mrb[3].mxu1  ;;  %v674_v35 = vsub.f32 1.0, %v1485_v32 }
 0x334   :  { %v1220_v28 = vadd.f32 %v1219_v27, %v1218_v25 }
 0x336   :  { %v664_v29 = vadd.f32 %v1220_v28, %v596_v39  ;;  %v1114_v28 = vld [vmem:[%s2317_s10] ss:$0 sm:$0xff]  ;;  %s1018_s10 = sshll.u32 %s1528_s9, 4  ;;  %s1019_s10 = int_to_ptr.vmem [resolvable:$true] %s1018_s10 }
 0x337   :  { %s1504_s5 = scalar_lea.vmem %s1019_s10, 32  ;;  %p1505_p1 = scmp.lt.s32.totalorder %s1019_s10, %s1019_s10 }
 0x338   :  { %v672_v31 = vadd.f32 %v671_v30, %v664_v29  ;;  %v1115_v30 = vld [vmem:[%s2318_s11] ss:$0 sm:$0xff]  ;;  %s1500_s11 = scalar_lea.vmem %s1019_s10, 16 }
 0x339   :  { %p1501_p0 = scmp.ne.s32.totalorder %s1019_s10, %s1500_s11  ;;  %p1506_p2 = scmp.lt.s32.totalorder %s1504_s5, %s1500_s11 }
 0x33a   :  { %1486 = vtanh.f32 %v672_v31 }
 0x33b   :  { %p1507_p3 = por %p1506_p2, %p1505_p1 }
 0x33d   :  { %p1508_p4 = pnand %p1507_p3, %p1501_p0 }
 0x344   :  { %v1487_v52 = vpop.eup %1486 }
 0x345   :  { %v675_v38 = vmul.f32 %v1487_v52, %v674_v35  ;;  %v1004_v35 = vand.u32 127, %v185_v24 }
 0x347   :  { %1265 = vmatmul.mubr.msk.f32.vlgmr.msra.gmra.mrb[4].mxu0 %vm689_vm8, %v675_v38  ;;  %1284 = vmatmul.mubr.msk.f32.vlgmr.msra.gmra.mrb[4].mxu1 %vm689_vm8, %v675_v38 }
 0x348   :  { %1459 = vmatpush3.bf16.msra.mxu0 %v1458_v53  ;;  %1302 = vmatprep.mubr.msk.f32.mxu0 %vm1526_vm7, %v1524_v8  ;;  %v1111_v8 = vld [vmem:[%s2314_s7 + $0xb8] sm:$0xff]  ;;  %v1007_v53 = vsub.s32 %v1004_v35, %v1846_v36 }
 0x349   :  { %1460 = vmatprep.subr.bf16.mxu0 %v1525_v46  ;;  %v1467_v50 = vpack.c.bf16 %v1111_v8, %v1110_v49 }
 0x34c   :  { %1462 = vmatpush3.bf16.msra.mxu0 %v1461_v44 }
 0x34d   :  { %1463 = vmatprep.subr.bf16.mxu0 %v1525_v46 }
 0x350   :  { %1465 = vmatpush3.bf16.msra.mxu0 %v1464_v48 }
 0x351   :  { %1466 = vmatprep.subr.bf16.mxu0 %v1525_v46 }
 0x354   :  { %1468 = vmatpush3.bf16.msra.mxu0 %v1467_v50 }
 0x357   :  { %1303 = vmatmul.mubr.msk.f32.vlgmr.msra.gmra.mrb[6].mxu0 %vm689_vm8, %v675_v38 }
 0x41a   :  { %v759_v55 = vpop.f32.mrb[4].mxu0  ;;  %v848_v26 = vpop.f32.mrb[4].mxu1 }
 0x41b   :  { %v760_v23 = vadd.f32 %v759_v55, %v688_v54  ;;  %v1266_v57 = vpop.f32.mrb[5].mxu0  ;;  %v1285_v58 = vpop.f32.mrb[5].mxu1  ;;  %v849_v60 = vadd.f32 %v848_v26, %v781_v56 }
 0x41d   :  { %v1093_v59 = vmul.f32 -1.442695, %v760_v23  ;;  %v1103_v46 = vmul.f32 -1.442695, %v849_v60 }
 0x41f   :  { %1488 = vpow2.f32 %v1093_v59 }
 0x420   :  { %1490 = vpow2.f32 %v1103_v46 }
 0x429   :  { %v1489_v61 = vpop.eup %1488 }
 0x42a   :  { %v766_v62 = vadd.f32 1.0, %v1489_v61  ;;  %v937_v63 = vpop.f32.mrb[6].mxu0  ;;  %v1491_v2 = vpop.eup %1490 }
 0x42b   :  { %v1304_v0 = vpop.f32.mrb[7].mxu0  ;;  %v855_v3 = vadd.f32 1.0, %v1491_v2  ;;  %v938_v6 = vadd.f32 %v937_v63, %v870_v4 }
 0x42c   :  { %1492 = vrcp.f32 %v766_v62 }
 0x42d   :  { %1494 = vrcp.f32 %v855_v3 }
 0x436   :  { %v1493_v5 = vpop.eup %1492 }
 0x437   :  { %v945_v7 = vmul.f32 %v1493_v5, %v944_v41  ;;  %v1495_v11 = vpop.eup %1494 }
 0x438   :  { %v948_v12 = vsub.f32 1.0, %v1495_v11 }
 0x439   :  { %v946_v1 = vadd.f32 %v945_v7, %v938_v6 }
 0x43b   :  { %1496 = vtanh.f32 %v946_v1 }
 0x445   :  { %v1497_v9 = vpop.eup %1496 }
 0x446   :  { %v949_v13 = vmul.f32 %v1497_v9, %v948_v12 }
 0x448   :  { %v952_v14 = vsel %vm689_vm8, %v949_v13, 0.0 }
 0x449   :  { %953 = vadd.xlane.f32.xlu1 %v952_v14 }
 0x4d6   :  { %v954_v15 = vpop.xlane.xlu1 %953 }
 0x4d7   :  { %v956_v16 = vmul.f32 0.015625, %v954_v15 }
 0x4d9   :  { %v957_v17 = vsub.f32 %v949_v13, %v956_v16 }
 0x4db   :  { %v958_v18 = vmul.f32 %v957_v17, %v957_v17 }
 0x4dd   :  { %v959_v19 = vsel %vm689_vm8, %v958_v18, 0.0 }
 0x4de   :  { %960 = vadd.xlane.f32.xlu1 %v959_v19 }
 0x4ef   :  { %994 = vperm.xlu1 %1474, %v991_v20  }
 0x56b   :  { %v961_v22 = vpop.xlane.xlu1 %960 }
 0x56c   :  { %v962_v25 = vmul.f32 0.015625, %v961_v22 }
 0x56e   :  { %v963_v39 = vadd.f32 1e-05, %v962_v25 }
 0x56f   :  { %v995_v34 = vpop.permute.xlu1 %994 }
 0x570   :  { %1498 = vrsqrt.f32 %v963_v39  ;;  %v1000_v52 = vrot.slane %v995_v34, %v1849_v37 }
 0x57a   :  { %v1499_v40 = vpop.eup %1498 }
 0x57b   :  { %v965_v27 = vmul.f32 %v1499_v40, %v957_v17 }
 0x57d   :  { %v972_v29 = vmul.f32 %v1113_v10, %v965_v27 }
 0x57f   :  { %v979_v31 = vadd.f32 %v1114_v28, %v972_v29 }
 0x581   :  { %v987_v32 = vmul.f32 %v1115_v30, %v979_v31 }
 0x583   :  { %v988_v33 = vsel %vm689_vm8, %v987_v32, 0.0 }
 0x584   :  { %989 = vadd.xlane.f32.xlu0 %v988_v33 }
 0x611   :  { %v990_v38 = vpop.xlane.xlu0 %989 }
 0x612   :  { %v1001_v42 = vadd.f32 %v1000_v52, %v990_v38 }
 0x614   :  { %v1008_v43 = vrot.slane %v1001_v42, %v1007_v53 }
 0x616   :  { %1011 = vst.msk [vmem:[#allocation3] sm:$0x1] %vm1010_vm9, %v1008_v43 }
 0x617   :  { %1511 = shalt.err (!%p1508_p4)
}
 0x618   :  { %s1512_s6 = scalar_lea.hbm %s2320_s13, 16 }
 0x619   :  { %p1513_p5 = scmp.ne.s32.totalorder %s2320_s13, %s1512_s6  ;;  %p1516_p6 = scmp.lt.u32.totalorder %s1512_s6, %s2320_s13 }
 0x61b   :  { %p1518_p7 = pnand %p1516_p6, %p1513_p5 }
 0x61d   :  { %1521 = shalt.err (!%p1518_p7)
}
 0x61e   :  { %1021 = dma.vmem_to_hbm [thread:$0]  %s1019_s10, 16, %s2320_s13, [#allocation4]  }
 0x61f   :  { %1522 = dma.done.wait [#allocation4], 16  }
 0x620   :  { %1523 = vsyncadd [#allocation4], 4294967280 }
 0x621   :  { %1025 = vsyncpa [#allocation4], 1 }

</bundles_post_ra>
